<compile_context>
chip_gen: v5e
topology: v5e:2x2
jax: 0.10.0
libtpu: 0.0.40
codegen_flags: <defaults>
</compile_context>

<pallas_src>
import math

import jax
import jax.numpy as jnp
from jax.experimental import pallas as pl
from jax.experimental.pallas import tpu as pltpu

LANE = 128


def _round_up(x, m):
    return (x + m - 1) // m * m


def _pad2(a, rows, cols, dtype=jnp.float32):
    r, c = a.shape
    return jnp.pad(a.astype(jnp.float32),
                   ((0, rows - r), (0, cols - c))).astype(dtype)


def _nbytes(shape, itemsize):
    n = 1
    for d in shape:
        n *= int(d)
    return n * int(itemsize)


def _device_vmem_bytes():
    try:
        info = pltpu.get_tpu_info()
        for attr in ("vmem_capacity_bytes", "vmem_size_bytes", "vmem_bytes"):
            v = getattr(info, attr, None)
            if v:
                return int(v)
    except Exception:
        pass
    return 64 * 1024 * 1024  # conservative (v7x per-core VMEM)


def _vmem_limit(nbytes):
    """Per-pass scoped-VMEM limit: footprint * 1.5 + headroom, clamped to HW."""
    cap = _device_vmem_bytes() * 9 // 10
    want = int(nbytes) * 3 // 2 + (4 << 20)
    want = max(want, 32 << 20)
    return int(min(want, cap))


# ---------------------------------------------------------------------------
# Collapsed-k pass 1: h1 = relu(x_self @ Ws1 + (A_rowslab @ x) @ Wn1 + b1)
# A block = (tm, n_pad); x resident (n_pad, f_in_p); self rows sliced in-kernel.
# ---------------------------------------------------------------------------
def sage1_collapsed_kernel(a_ref, x_ref, ws_ref, wn_ref, b_ref, h1_ref):
    i = pl.program_id(0)
    tm = h1_ref.shape[0]
    agg = jnp.dot(a_ref[...], x_ref[...], preferred_element_type=jnp.float32)
    row0 = pl.multiple_of(i * tm, tm)
    x_self = x_ref[pl.ds(row0, tm), :]
    h = (jnp.dot(x_self, ws_ref[...], preferred_element_type=jnp.float32)
         + jnp.dot(agg.astype(wn_ref.dtype), wn_ref[...],
                   preferred_element_type=jnp.float32)
         + b_ref[...])
    h1_ref[...] = jnp.maximum(h, 0.0).astype(h1_ref.dtype)


# ---------------------------------------------------------------------------
# Collapsed-k pass 2: h2 = h1_self @ Ws2 + (A_rowslab @ h1) @ Wn2 + b2
#                     pu = h2 @ Wu + bp ;  pv = h2 @ Wv   (reassociated predictor)
# ---------------------------------------------------------------------------
def sage2_pred_collapsed_kernel(a_ref, h1_ref, ws_ref, wn_ref, b_ref,
                                wu_ref, wv_ref, bp_ref, pu_ref, pv_ref):
    i = pl.program_id(0)
    tm = pu_ref.shape[0]
    agg = jnp.dot(a_ref[...], h1_ref[...], preferred_element_type=jnp.float32)
    row0 = pl.multiple_of(i * tm, tm)
    h1_self = h1_ref[pl.ds(row0, tm), :]
    h2 = (jnp.dot(h1_self, ws_ref[...], preferred_element_type=jnp.float32)
          + jnp.dot(agg.astype(wn_ref.dtype), wn_ref[...],
                    preferred_element_type=jnp.float32)
          + b_ref[...])
    h2c = h2.astype(wu_ref.dtype)
    pu_ref[...] = (jnp.dot(h2c, wu_ref[...], preferred_element_type=jnp.float32)
                   + bp_ref[...]).astype(pu_ref.dtype)
    pv_ref[...] = jnp.dot(h2c, wv_ref[...],
                          preferred_element_type=jnp.float32).astype(pv_ref.dtype)


# ---------------------------------------------------------------------------
# k-tiled fallback pass 1 (f32 VMEM accumulator, pl.when init/finalize).
# ---------------------------------------------------------------------------
def sage1_tiled_kernel(a_ref, x_cols_ref, x_rows_ref, ws_ref, wn_ref, b_ref,
                       h1_ref, acc_ref):
    k = pl.program_id(1)

    @pl.when(k == 0)
    def _():
        acc_ref[...] = jnp.zeros_like(acc_ref)

    acc_ref[...] += jnp.dot(a_ref[...], x_cols_ref[...],
                            preferred_element_type=jnp.float32)

    @pl.when(k == pl.num_programs(1) - 1)
    def _():
        h = (jnp.dot(x_rows_ref[...], ws_ref[...],
                     preferred_element_type=jnp.float32)
             + jnp.dot(acc_ref[...].astype(wn_ref.dtype), wn_ref[...],
                       preferred_element_type=jnp.float32)
             + b_ref[...])
        h1_ref[...] = jnp.maximum(h, 0.0).astype(h1_ref.dtype)


# ---------------------------------------------------------------------------
# k-tiled fallback pass 2.
# ---------------------------------------------------------------------------
def sage2_pred_tiled_kernel(a_ref, h1_cols_ref, h1_rows_ref, ws_ref, wn_ref,
                            b_ref, wu_ref, wv_ref, bp_ref, pu_ref, pv_ref,
                            acc_ref):
    k = pl.program_id(1)

    @pl.when(k == 0)
    def _():
        acc_ref[...] = jnp.zeros_like(acc_ref)

    acc_ref[...] += jnp.dot(a_ref[...], h1_cols_ref[...],
                            preferred_element_type=jnp.float32)

    @pl.when(k == pl.num_programs(1) - 1)
    def _():
        h2 = (jnp.dot(h1_rows_ref[...], ws_ref[...],
                      preferred_element_type=jnp.float32)
              + jnp.dot(acc_ref[...].astype(wn_ref.dtype), wn_ref[...],
                        preferred_element_type=jnp.float32)
              + b_ref[...])
        h2c = h2.astype(wu_ref.dtype)
        pu_ref[...] = (jnp.dot(h2c, wu_ref[...],
                               preferred_element_type=jnp.float32)
                       + bp_ref[...]).astype(pu_ref.dtype)
        pv_ref[...] = jnp.dot(h2c, wv_ref[...],
                              preferred_element_type=jnp.float32).astype(pv_ref.dtype)


# ---------------------------------------------------------------------------
# Pass 3: score[e] = pu[src[e]] + pv[dst[e]].  src/dst scalar-prefetched into
# SMEM; 8 edges are gathered per loop step and written with one (8,128)
# full-vreg store (no per-edge masked stores).
# ---------------------------------------------------------------------------
def edge_gather_kernel(src_ref, dst_ref, pu_ref, pv_ref, score_ref):
    i = pl.program_id(0)
    te = score_ref.shape[0]   # static edge-tile size
    sub = 8                   # edges per unrolled batch -> one (8, 128) store

    @pl.loop(0, te // sub)
    def _(j):
        base = i * te + j * sub
        rows = []
        for r in range(sub):  # static unroll
            s = src_ref[base + r]
            d = dst_ref[base + r]
            rows.append(pu_ref[pl.ds(s, 1), :] + pv_ref[pl.ds(d, 1), :])
        off = pl.multiple_of(j * sub, sub)
        score_ref[pl.ds(off, sub), :] = jnp.concatenate(rows, axis=0)


# ---------------------------------------------------------------------------
# Wrapper
# ---------------------------------------------------------------------------
def model_forward(a_norm, x, e, params, *, tm=256, tk=512, te=128,
                  compute_dtype=jnp.bfloat16, collapse_k=None):
    """Forward pass of `Model`.

    `e` (edge features) is accepted for API parity but unused, exactly as in
    the PyTorch module.  `compute_dtype` is the matmul-operand dtype for
    A_norm / x / h1 / weights (bfloat16 by default for MXU+HBM throughput;
    accumulation, biases, and pu/pv logits stay f32).  Pass
    compute_dtype=jnp.float32 for bit-faithful f32 semantics.
    """
    del e
    (ws1, wn1, b1, ws2, wn2, b2, src, dst, wu, wv, bp) = params

    assert tm % 8 == 0 and tk % LANE == 0 and te % 8 == 0

    N = a_norm.shape[0]
    F_in = x.shape[1]
    F_hid = ws1.shape[1]
    F_out = ws2.shape[1]
    n_cls = wu.shape[1]
    E = src.shape[0]

    cdt = jnp.dtype(compute_dtype)
    cb = cdt.itemsize
    f32 = jnp.float32

    # Padded, lane-dense shapes; n_pad is a multiple of lcm(tm, tk) so both
    # the collapsed and the k-tiled grids divide it exactly.
    n_pad = _round_up(N, math.lcm(tm, tk))
    f_in_p = _round_up(F_in, LANE)
    f_hid_p = _round_up(F_hid, LANE)
    f_out_p = _round_up(F_out, LANE)
    c_pad = _round_up(n_cls, LANE)
    e_pad = _round_up(E, te)

    a_p = _pad2(a_norm, n_pad, n_pad, cdt)
    x_p = _pad2(x, n_pad, f_in_p, cdt)
    ws1_p = _pad2(ws1, f_in_p, f_hid_p, cdt)
    wn1_p = _pad2(wn1, f_in_p, f_hid_p, cdt)
    b1_p = _pad2(b1, 1, f_hid_p, f32)          # biases stay f32
    ws2_p = _pad2(ws2, f_hid_p, f_out_p, cdt)
    wn2_p = _pad2(wn2, f_hid_p, f_out_p, cdt)
    b2_p = _pad2(b2, 1, f_out_p, f32)
    wu_p = _pad2(wu, f_out_p, c_pad, cdt)
    wv_p = _pad2(wv, f_out_p, c_pad, cdt)
    bp_p = _pad2(bp, 1, c_pad, f32)
    src_p = jnp.pad(src.astype(jnp.int32), (0, e_pad - E))
    dst_p = jnp.pad(dst.astype(jnp.int32), (0, e_pad - E))

    grid_rows = n_pad // tm
    grid_k = n_pad // tk
    vmem_cap = _device_vmem_bytes()

    # VMEM footprint estimates (double-buffered operands) used both to pick
    # the collapsed vs. tiled path and to set per-pass vmem_limit_bytes.
    p1_collapsed = 2 * (_nbytes((tm, n_pad), cb) + _nbytes((n_pad, f_in_p), cb)
                        + 2 * _nbytes((f_in_p, f_hid_p), cb)
                        + _nbytes((1, f_hid_p), 4) + _nbytes((tm, f_hid_p), cb))
    p2_collapsed = 2 * (_nbytes((tm, n_pad), cb) + _nbytes((n_pad, f_hid_p), cb)
                        + 2 * _nbytes((f_hid_p, f_out_p), cb)
                        + 2 * _nbytes((f_out_p, c_pad), cb)
                        + _nbytes((1, f_out_p), 4) + _nbytes((1, c_pad), 4)
                        + 2 * _nbytes((tm, c_pad), 4))
    if collapse_k is None:
        collapse_k = max(p1_collapsed, p2_collapsed) <= int(vmem_cap * 0.45)

    if collapse_k:
        # ---- Pass 1 (collapsed k): A row-slab + resident x, no scratch -----
        h1 = pl.pallas_call(
            sage1_collapsed_kernel,
            out_shape=jax.ShapeDtypeStruct((n_pad, f_hid_p), cdt),
            grid_spec=pltpu.PrefetchScalarGridSpec(
                num_scalar_prefetch=0,
                grid=(grid_rows,),
                in_specs=[
                    pl.BlockSpec((tm, n_pad), lambda i: (i, 0)),      # A row-slab
                    pl.BlockSpec((n_pad, f_in_p), lambda i: (0, 0)),  # x resident
                    pl.BlockSpec((f_in_p, f_hid_p), lambda i: (0, 0)),
                    pl.BlockSpec((f_in_p, f_hid_p), lambda i: (0, 0)),
                    pl.BlockSpec((1, f_hid_p), lambda i: (0, 0)),
                ],
                out_specs=pl.BlockSpec((tm, f_hid_p), lambda i: (i, 0)),
            ),
            compiler_params=pltpu.CompilerParams(
                dimension_semantics=("parallel",),
                vmem_limit_bytes=_vmem_limit(p1_collapsed),
            ),
        )(a_p, x_p, ws1_p, wn1_p, b1_p)

        # ---- Pass 2 (collapsed k): SAGE layer 2 + per-node predictor logits
        pu, pv = pl.pallas_call(
            sage2_pred_collapsed_kernel,
            out_shape=(jax.ShapeDtypeStruct((n_pad, c_pad), f32),
                       jax.ShapeDtypeStruct((n_pad, c_pad), f32)),
            grid_spec=pltpu.PrefetchScalarGridSpec(
                num_scalar_prefetch=0,
                grid=(grid_rows,),
                in_specs=[
                    pl.BlockSpec((tm, n_pad), lambda i: (i, 0)),       # A row-slab
                    pl.BlockSpec((n_pad, f_hid_p), lambda i: (0, 0)),  # h1 resident
                    pl.BlockSpec((f_hid_p, f_out_p), lambda i: (0, 0)),
                    pl.BlockSpec((f_hid_p, f_out_p), lambda i: (0, 0)),
                    pl.BlockSpec((1, f_out_p), lambda i: (0, 0)),
                    pl.BlockSpec((f_out_p, c_pad), lambda i: (0, 0)),
                    pl.BlockSpec((f_out_p, c_pad), lambda i: (0, 0)),
                    pl.BlockSpec((1, c_pad), lambda i: (0, 0)),
                ],
                out_specs=(pl.BlockSpec((tm, c_pad), lambda i: (i, 0)),
                           pl.BlockSpec((tm, c_pad), lambda i: (i, 0))),
            ),
            compiler_params=pltpu.CompilerParams(
                dimension_semantics=("parallel",),
                vmem_limit_bytes=_vmem_limit(p2_collapsed),
            ),
        )(a_p, h1, ws2_p, wn2_p, b2_p, wu_p, wv_p, bp_p)
    else:
        # ---- k-tiled fallback (large N): f32 accumulator + pl.when ---------
        p1_tiled = (2 * (_nbytes((tm, tk), cb) + _nbytes((tk, f_in_p), cb)
                         + _nbytes((tm, f_in_p), cb)
                         + 2 * _nbytes((f_in_p, f_hid_p), cb)
                         + _nbytes((tm, f_hid_p), cb))
                    + _nbytes((tm, f_in_p), 4))
        p2_tiled = (2 * (_nbytes((tm, tk), cb) + _nbytes((tk, f_hid_p), cb)
                         + _nbytes((tm, f_hid_p), cb)
                         + 2 * _nbytes((f_hid_p, f_out_p), cb)
                         + 2 * _nbytes((f_out_p, c_pad), cb)
                         + 2 * _nbytes((tm, c_pad), 4))
                    + _nbytes((tm, f_hid_p), 4))

        h1 = pl.pallas_call(
            sage1_tiled_kernel,
            out_shape=jax.ShapeDtypeStruct((n_pad, f_hid_p), cdt),
            grid_spec=pltpu.PrefetchScalarGridSpec(
                num_scalar_prefetch=0,
                grid=(grid_rows, grid_k),
                in_specs=[
                    pl.BlockSpec((tm, tk), lambda i, k: (i, k)),        # A tile
                    pl.BlockSpec((tk, f_in_p), lambda i, k: (k, 0)),    # x (neigh)
                    pl.BlockSpec((tm, f_in_p), lambda i, k: (i, 0)),    # x (self)
                    pl.BlockSpec((f_in_p, f_hid_p), lambda i, k: (0, 0)),
                    pl.BlockSpec((f_in_p, f_hid_p), lambda i, k: (0, 0)),
                    pl.BlockSpec((1, f_hid_p), lambda i, k: (0, 0)),
                ],
                out_specs=pl.BlockSpec((tm, f_hid_p), lambda i, k: (i, 0)),
                scratch_shapes=[pltpu.VMEM((tm, f_in_p), f32)],
            ),
            compiler_params=pltpu.CompilerParams(
                dimension_semantics=("parallel", "arbitrary"),
                vmem_limit_bytes=_vmem_limit(p1_tiled),
            ),
        )(a_p, x_p, x_p, ws1_p, wn1_p, b1_p)

        pu, pv = pl.pallas_call(
            sage2_pred_tiled_kernel,
            out_shape=(jax.ShapeDtypeStruct((n_pad, c_pad), f32),
                       jax.ShapeDtypeStruct((n_pad, c_pad), f32)),
            grid_spec=pltpu.PrefetchScalarGridSpec(
                num_scalar_prefetch=0,
                grid=(grid_rows, grid_k),
                in_specs=[
                    pl.BlockSpec((tm, tk), lambda i, k: (i, k)),        # A tile
                    pl.BlockSpec((tk, f_hid_p), lambda i, k: (k, 0)),   # h1 (neigh)
                    pl.BlockSpec((tm, f_hid_p), lambda i, k: (i, 0)),   # h1 (self)
                    pl.BlockSpec((f_hid_p, f_out_p), lambda i, k: (0, 0)),
                    pl.BlockSpec((f_hid_p, f_out_p), lambda i, k: (0, 0)),
                    pl.BlockSpec((1, f_out_p), lambda i, k: (0, 0)),
                    pl.BlockSpec((f_out_p, c_pad), lambda i, k: (0, 0)),
                    pl.BlockSpec((f_out_p, c_pad), lambda i, k: (0, 0)),
                    pl.BlockSpec((1, c_pad), lambda i, k: (0, 0)),
                ],
                out_specs=(pl.BlockSpec((tm, c_pad), lambda i, k: (i, 0)),
                           pl.BlockSpec((tm, c_pad), lambda i, k: (i, 0))),
                scratch_shapes=[pltpu.VMEM((tm, f_hid_p), f32)],
            ),
            compiler_params=pltpu.CompilerParams(
                dimension_semantics=("parallel", "arbitrary"),
                vmem_limit_bytes=_vmem_limit(p2_tiled),
            ),
        )(a_p, h1, h1, ws2_p, wn2_p, b2_p, wu_p, wv_p, bp_p)

    # ---- Pass 3: per-edge gather of the node logits ------------------------
    p3_bytes = 2 * (2 * _nbytes((n_pad, c_pad), 4) + _nbytes((te, c_pad), 4))
    score_pad = pl.pallas_call(
        edge_gather_kernel,
        out_shape=jax.ShapeDtypeStruct((e_pad, c_pad), f32),
        grid_spec=pltpu.PrefetchScalarGridSpec(
            num_scalar_prefetch=2,                       # src, dst -> SMEM
            grid=(e_pad // te,),
            in_specs=[
                pl.BlockSpec((n_pad, c_pad), lambda i, s, d: (0, 0)),  # pu resident
                pl.BlockSpec((n_pad, c_pad), lambda i, s, d: (0, 0)),  # pv resident
            ],
            out_specs=pl.BlockSpec((te, c_pad), lambda i, s, d: (i, 0)),
        ),
        compiler_params=pltpu.CompilerParams(
            dimension_semantics=("parallel",),
            vmem_limit_bytes=_vmem_limit(p3_bytes),
        ),
    )(src_p, dst_p, pu, pv)

    return score_pad[:E, :n_cls]


def reference_forward(a_norm, x, params):
    (ws1, wn1, b1, ws2, wn2, b2, src, dst, wu, wv, bp) = params
    h1 = jnp.maximum(x @ ws1 + (a_norm @ x) @ wn1 + b1, 0.0)
    h2 = h1 @ ws2 + (a_norm @ h1) @ wn2 + b2
    return h2[src] @ wu + h2[dst] @ wv + bp


if __name__ == "__main__":
    key = jax.random.PRNGKey(0)
    ks = jax.random.split(key, 12)

    # Small synthetic graph / feature sizes.
    N = 8            # nodes
    E = 16           # edges
    F_IN = 16        # in_features
    F_HID = 32       # hidden_features
    F_OUT = F_IN     # out_features (must equal in_features for the predictor)
    F_EDGE = 8       # edge feature dim (unused by forward, as in PyTorch)
    N_CLS = 3        # predictor output classes

    # Graph: deterministic edges (ring + skip) so every node has in-degree >= 1.
    src = jnp.array([i % N for i in range(E)], dtype=jnp.int32)
    dst = jnp.array([(i + 1 + (i // N)) % N for i in range(E)], dtype=jnp.int32)

    adj = jnp.zeros((N, N), jnp.float32).at[dst, src].add(1.0)
    deg = jnp.maximum(adj.sum(axis=1, keepdims=True), 1.0)
    a_norm = adj / deg                                   # [N, N] mean aggregation

    # Node / edge features.
    x = jax.random.normal(ks[0], (N, F_IN), jnp.float32)
    e = jax.random.normal(ks[1], (E, F_EDGE), jnp.float32)

    # Deterministic parameters (SAGEConv: fc_self has bias, fc_neigh no bias).
    s = 0.1
    ws1 = s * jax.random.normal(ks[2], (F_IN, F_HID), jnp.float32)
    wn1 = s * jax.random.normal(ks[3], (F_IN, F_HID), jnp.float32)
    b1 = s * jax.random.normal(ks[4], (1, F_HID), jnp.float32)
    ws2 = s * jax.random.normal(ks[5], (F_HID, F_OUT), jnp.float32)
    wn2 = s * jax.random.normal(ks[6], (F_HID, F_OUT), jnp.float32)
    b2 = s * jax.random.normal(ks[7], (1, F_OUT), jnp.float32)
    # MLPPredictor: Linear(2 * F_IN, 3) split into [Wu ; Wv].
    wu = s * jax.random.normal(ks[8], (F_OUT, N_CLS), jnp.float32)
    wv = s * jax.random.normal(ks[9], (F_OUT, N_CLS), jnp.float32)
    bp = s * jax.random.normal(ks[10], (1, N_CLS), jnp.float32)

    params = (ws1, wn1, b1, ws2, wn2, b2, src, dst, wu, wv, bp)
    ref = reference_forward(a_norm, x, params)

    # 1) f32 operands, collapsed-k path (auto-selected at these sizes).
    out_f32 = jax.block_until_ready(
        model_forward(a_norm, x, e, params, compute_dtype=jnp.float32))
    assert out_f32.shape == (E, N_CLS)
    assert jnp.allclose(out_f32, ref, atol=1e-4, rtol=1e-4), "f32 collapsed-k mismatch"

    # 2) f32 operands, k-tiled fallback path (forced).
    out_tiled = jax.block_until_ready(
        model_forward(a_norm, x, e, params, compute_dtype=jnp.float32,
                      collapse_k=False))
    assert jnp.allclose(out_tiled, ref, atol=1e-4, rtol=1e-4), "f32 tiled-k mismatch"

    # 3) Default fast path: bf16 matmul operands, f32 accumulation.
    out_bf16 = jax.block_until_ready(model_forward(a_norm, x, e, params))
    assert out_bf16.shape == (E, N_CLS)
    assert jnp.allclose(out_bf16, ref, atol=5e-2, rtol=5e-2), "bf16 mismatch"

    print("KERNEL_OK")
</pallas_src>

<mosaic_0001>
module attributes {stable_mosaic.version = 11 : i64} {
  func.func @sage1_collapsed_kernel(%arg0: i32, %arg1: memref<256x512xf32, #tpu.memory_space<vmem>>, %arg2: memref<512x128xf32, #tpu.memory_space<vmem>>, %arg3: memref<128x128xf32, #tpu.memory_space<vmem>>, %arg4: memref<128x128xf32, #tpu.memory_space<vmem>>, %arg5: memref<1x128xf32, #tpu.memory_space<vmem>>, %arg6: memref<256x128xf32, #tpu.memory_space<vmem>>) attributes {dimension_semantics = [#tpu.dimension_semantics<parallel>], iteration_bounds = array<i64: 2>, scalar_prefetch = 0 : i64, scratch_operands = 0 : i64, tpu.core_type = #tpu.core_type<tc>, window_params = [{transform_indices = @transform_0, window_bounds = array<i64: 256, 512>}, {pipeline_mode = #tpu.pipeline_mode<synchronous>, transform_indices = @transform_1, window_bounds = array<i64: 512, 128>}, {pipeline_mode = #tpu.pipeline_mode<synchronous>, transform_indices = @transform_2, window_bounds = array<i64: 128, 128>}, {pipeline_mode = #tpu.pipeline_mode<synchronous>, transform_indices = @transform_3, window_bounds = array<i64: 128, 128>}, {pipeline_mode = #tpu.pipeline_mode<synchronous>, transform_indices = @transform_4, window_bounds = array<i64: 1, 128>}, {transform_indices = @transform_5, window_bounds = array<i64: 256, 128>}]} {
    %c0 = arith.constant 0 : index
    %c0_0 = arith.constant 0 : index
    %0 = vector.load %arg1[%c0, %c0_0] : memref<256x512xf32, #tpu.memory_space<vmem>>, vector<256x512xf32>
    %c0_1 = arith.constant 0 : index
    %c0_2 = arith.constant 0 : index
    %1 = vector.load %arg2[%c0_1, %c0_2] : memref<512x128xf32, #tpu.memory_space<vmem>>, vector<512x128xf32>
    %cst = arith.constant dense<0.000000e+00> : vector<256x128xf32>
    %2 = tpu.matmul %0, %1, %cst {dimension_numbers = #tpu.dot_dimension_numbers<[1], [0], [0], [1], [0, 0, 1, 1], [], []>} : vector<256x512xf32>, vector<512x128xf32>, vector<256x128xf32> -> vector<256x128xf32>
    %c256_i32 = arith.constant 256 : i32
    %3 = arith.muli %arg0, %c256_i32 : i32
    %4 = tpu.assume_multiple %3, 256 : i32
    %5 = arith.index_cast %4 : i32 to index
    %c0_3 = arith.constant 0 : index
    %6 = vector.load %arg2[%5, %c0_3] : memref<512x128xf32, #tpu.memory_space<vmem>>, vector<256x128xf32>
    %c0_4 = arith.constant 0 : index
    %c0_5 = arith.constant 0 : index
    %7 = vector.load %arg3[%c0_4, %c0_5] : memref<128x128xf32, #tpu.memory_space<vmem>>, vector<128x128xf32>
    %cst_6 = arith.constant dense<0.000000e+00> : vector<256x128xf32>
    %8 = tpu.matmul %6, %7, %cst_6 {dimension_numbers = #tpu.dot_dimension_numbers<[1], [0], [0], [1], [0, 0, 1, 1], [], []>} : vector<256x128xf32>, vector<128x128xf32>, vector<256x128xf32> -> vector<256x128xf32>
    %c0_7 = arith.constant 0 : index
    %c0_8 = arith.constant 0 : index
    %9 = vector.load %arg4[%c0_7, %c0_8] : memref<128x128xf32, #tpu.memory_space<vmem>>, vector<128x128xf32>
    %cst_9 = arith.constant dense<0.000000e+00> : vector<256x128xf32>
    %10 = tpu.matmul %2, %9, %cst_9 {dimension_numbers = #tpu.dot_dimension_numbers<[1], [0], [0], [1], [0, 0, 1, 1], [], []>} : vector<256x128xf32>, vector<128x128xf32>, vector<256x128xf32> -> vector<256x128xf32>
    %11 = arith.addf %8, %10 : vector<256x128xf32>
    %c0_10 = arith.constant 0 : index
    %c0_11 = arith.constant 0 : index
    %12 = vector.load %arg5[%c0_10, %c0_11] : memref<1x128xf32, #tpu.memory_space<vmem>>, vector<1x128xf32>
    %13 = vector.broadcast %12 : vector<1x128xf32> to vector<256x128xf32>
    %14 = arith.addf %11, %13 : vector<256x128xf32>
    %cst_12 = arith.constant 0.000000e+00 : f32
    %15 = vector.broadcast %cst_12 : f32 to vector<256x128xf32>
    %16 = arith.maximumf %14, %15 : vector<256x128xf32>
    %c0_13 = arith.constant 0 : index
    %c0_14 = arith.constant 0 : index
    %17 = vector.load %arg6[%c0_13, %c0_14] : memref<256x128xf32, #tpu.memory_space<vmem>>, vector<256x128xf32>
    tpu.vector_store %arg6[%c0_13, %c0_14], %16 {strides = array<i32>} : memref<256x128xf32, #tpu.memory_space<vmem>>, vector<256x128xf32>,
    return
  }
  func.func @transform_0(%arg0: i32) -> (i32, i32) {
    %c0_i32 = arith.constant 0 : i32
    %c0_i32_0 = arith.constant 0 : i32
    return %arg0, %c0_i32 : i32, i32
  }
  func.func @transform_1(%arg0: i32) -> (i32, i32) {
    %c0_i32 = arith.constant 0 : i32
    %c0_i32_0 = arith.constant 0 : i32
    %c0_i32_1 = arith.constant 0 : i32
    return %c0_i32, %c0_i32_0 : i32, i32
  }
  func.func @transform_2(%arg0: i32) -> (i32, i32) {
    %c0_i32 = arith.constant 0 : i32
    %c0_i32_0 = arith.constant 0 : i32
    %c0_i32_1 = arith.constant 0 : i32
    return %c0_i32, %c0_i32_0 : i32, i32
  }
  func.func @transform_3(%arg0: i32) -> (i32, i32) {
    %c0_i32 = arith.constant 0 : i32
    %c0_i32_0 = arith.constant 0 : i32
    %c0_i32_1 = arith.constant 0 : i32
    return %c0_i32, %c0_i32_0 : i32, i32
  }
  func.func @transform_4(%arg0: i32) -> (i32, i32) {
    %c0_i32 = arith.constant 0 : i32
    %c0_i32_0 = arith.constant 0 : i32
    %c0_i32_1 = arith.constant 0 : i32
    return %c0_i32, %c0_i32_0 : i32, i32
  }
  func.func @transform_5(%arg0: i32) -> (i32, i32) {
    %c0_i32 = arith.constant 0 : i32
    %c0_i32_0 = arith.constant 0 : i32
    return %arg0, %c0_i32 : i32, i32
  }
}

</mosaic_0001>

<bundles_post_ra>
// kernel: tpu_custom_call.1
= control target key start
LH: loop header
LB: loop body
LE: loop exit
PB: predicated region body
PF: predicated region fallthrough
CT: control target
= control target key end

     0   :  { %10 = vsyncpa [#allocation3], 0  ;;  %s2279_s0 = inlined_call_operand.hbm [shape: f32[512,512], index: 0, kind: input, shape index: {}]   ;;  %s2280_s1 = inlined_call_operand.hbm [shape: f32[512,128], index: 1, kind: input, shape index: {}]   ;;  %s2281_s2 = inlined_call_operand.hbm [shape: f32[128,128], index: 2, kind: input, shape index: {}]   ;;  %s2282_s3 = inlined_call_operand.hbm [shape: f32[128,128], index: 3, kind: input, shape index: {}]   ;;  %s2283_s4 = inlined_call_operand.vmem [shape: f32[1,128], index: 4, kind: input, shape index: {}]   ;;  %s2284_s5 = inlined_call_operand.hbm [shape: f32[512,128], index: 5, kind: output, shape index: {}]  }
   0x1   :  { %12 = vsyncpa [#allocation3 + $0x1], 0 }
   0x2   :  { %13 = vsyncpa [#allocation6], 0 }
   0x3   :  { %14 = vsyncpa [#allocation9], 0 }
   0x4   :  { %15 = vsyncpa [#allocation4], 0 }
   0x5   :  { %17 = vsyncpa [#allocation4 + $0x1], 0  ;;  %s1830_s18 = smov 0   ;;  %s1832_s19 = smov 0  }
   0x6   :  { %s1834_s20 = smov 0   ;;  %s1836_s21 = smov 0  }
   0x7 LB: > { %s1851_s22 = sadd.s32 4294967295, %s1789_s21   ;;  %s1454_s23 = sadd.s32 4294967294, %s1789_s21   ;;  %s1789_s21 = sphi %s1836_s21, %s2295_s21   ;;  %s1785_s20 = sphi %s1834_s20, %s2294_s20   ;;  %s1781_s19 = sphi %s1832_s19, %s2293_s19   ;;  %s1777_s18 = sphi %s1830_s18, %s2292_s18  }
   0x8   : > { %p43_p0 = scmp.ne.s32.totalorder %s1781_s19, %s1777_s18  ;;  %p44_p1 = scmp.eq.s32.totalorder %s1851_s22, 0 }
   0x9   : > { %p151_p2 = scmp.eq.s32.totalorder %s1851_s22, 1  ;;  %p157_p3 = scmp.eq.s32.totalorder %s1454_s23, 1 }
   0xa   : > { %p1860_p4 = por %p44_p1, %p43_p0  ;;  %p1455_p5 = scmp.ge.s32.totalorder %s1789_s21, 1 }
   0xb   : > { %p1865_p6 = por %p157_p3, %p43_p0  ;;  %p164_p7 = scmp.lt.s32.totalorder %s1789_s21, 3 }
   0xc   : > { %s175_s28 = sshll.u32 %s2280_s1, 4  ;;  %s1791_s30 = smov [#allocation5]   ;;  %s176_s28 = int_to_ptr.hbm [resolvable:$true] %s175_s28 }
   0xd   : > { %p1873_p8 = pnand %p1455_p5, %p164_p7  ;;  %s177_s6 = sshll.u32 %s1791_s30, 4  ;;  %s178_s6 = int_to_ptr.vmem [resolvable:$true] %s177_s6 }
   0xe   : > { %s189_s10 = sshll.u32 %s2281_s2, 4  ;;  %s1792_s11 = smov 128   ;;  %s190_s10 = int_to_ptr.hbm [resolvable:$true] %s189_s10 }
   0xf   : > { %p1527_p9 = pneg %p1873_p8  ;;  %s1793_s12 = smov 8  }
  0x10   : > { %s1794_s13 = smov [#allocation7]   ;;  %s203_s17 = sshll.u32 %s2282_s3, 4  ;;  %s204_s17 = int_to_ptr.hbm [resolvable:$true] %s203_s17 }
  0x11   : > { %p1881_p10 = pnand %p1527_p9, %p44_p1  ;;  %s191_s14 = sshll.u32 %s1794_s13, 4  ;;  %s192_s14 = int_to_ptr.vmem [resolvable:$true] %s191_s14 }
  0x12   : > { %s1795_s23 = smov [#allocation8]   ;;  %s1897_s27 = sadd.s32 1, %s1789_s21  }
  0x13   : > { %1530 = dma.hbm_to_vmem [thread:$0]  (!%p1881_p10), %s176_s28, 8192, %s178_s6, [#allocation6], %s1792_s11, %s1792_s11, %s1793_s12  }
  0x14   : > { %1533 = dma.hbm_to_vmem [thread:$0]  (!%p1881_p10), %s190_s10, 2048, %s192_s14, [#allocation6], %s1792_s11, %s1792_s11, %s1793_s12  }
  0x15   : > { %s205_s26 = sshll.u32 %s1795_s23, 4  ;;  %s27_s28 = ssub.s32 %s1789_s21, %s1897_s27  ;;  %s206_s26 = int_to_ptr.vmem [resolvable:$true] %s205_s26 }
  0x16   : > { %1536 = dma.hbm_to_vmem [thread:$0]  (!%p1881_p10), %s204_s17, 2048, %s206_s26, [#allocation9], %s1792_s11, %s1792_s11, %s1793_s12  }
  0x17   : > { %s30_s30 = sadd.s32 1, %s1785_s20  ;;  %p28_p12 = scmp.eq.s32.totalorder %s27_s28, 0 }
  0x18   : > { %p37_p13 = scmp.ne.s32.totalorder %s1785_s20, %s1781_s19  ;;  %p38_p0 = scmp.eq.s32.totalorder %s1789_s21, 0 }
  0x19   : > { %p1548_p3 = scmp.lt.s32.totalorder %s1789_s21, 2  ;;  %s222_s9 = sand.u32 1, %s1785_s20  }
  0x1a   : > { %s1909_s6 = scalar_select %p28_p12, %s1785_s20, %s30_s30  }
  0x1b   : > { %p39_p5 = por %p38_p0, %p37_p13  ;;  %p1913_p7 = por %p151_p2, %p37_p13 }
  0x1c   : > { %s1477_s10 = sshll.u32 %s1789_s21, 10  ;;  %s1460_s7 = sshll.u32 %s222_s9, 10 }
  0x1d   : > { %s232_s12 = scalar_lea.hbm %s2279_s0, %s1477_s10  ;;  %s226_s15 = scalar_lea.vmem [#allocation2], %s1460_s7 }
  0x1e   : > { %s233_s14 = sshll.u32 %s232_s12, 4  ;;  %s235_s16 = sshll.u32 %s226_s15, 4  ;;  %s234_s14 = int_to_ptr.hbm [resolvable:$true] %s233_s14  ;;  %s236_s16 = int_to_ptr.vmem [resolvable:$true] %s235_s16 }
  0x1f   : > { %p1924_p9 = pnand %p1548_p3, %p39_p5  ;;  %s223_s23 = scalar_lea.sflag [#allocation3], %s222_s9 }
  0x20   : > { %s1685_s26 = sshra.s32 %s234_s14, 4  ;;  %s1692_s7 = scalar_lea.hbm %s2279_s0, 2048  ;;  %s1686_s26 = int_to_ptr.hbm [resolvable:$true] %s1685_s26 }
  0x21   : > { %s1687_s28 = scalar_lea.hbm %s1686_s26, 1024  ;;  %p1689_p10 = pneg %p1924_p9 }
  0x22   : > { %p1688_p2 = scmp.ne.s32.totalorder %s1686_s26, %s1687_s28  ;;  %p1693_p0 = scmp.lt.s32.totalorder %s1686_s26, %s2279_s0 }
  0x23   : > { %p1694_p3 = scmp.lt.s32.totalorder %s1692_s7, %s1687_s28 }
  0x24   : > { %p1690_p12 = pnand %p1689_p10, %p1688_p2 }
  0x25   : > { %p1695_p5 = por %p1694_p3, %p1693_p0 }
  0x26   : > { %p1691_p13 = pneg %p1690_p12 }
  0x28   : > { %p1696_p11 = pnand %p1695_p5, %p1691_p13 }
  0x2a   : > { %1699 = shalt.err (!%p1696_p11)
}
  0x2b   : > { %s1796_s9 = smov 512   ;;  %s1797_s12 = smov 32  }
  0x2c   : > { %1540 = dma.hbm_to_vmem [thread:$0]  (!%p1924_p9), %s234_s14, 16384, %s236_s16, %s223_s23, %s1796_s9, %s1796_s9, %s1797_s12  }
  0x2d   : > { %247 = sbr.rel (%p1873_p8) target bundleno = 735 (0x2df), region = 40  ;;  %s1941_s15 = sand.u32 (!%p1873_p8), 1, %s1781_s19  }
  0x2e   : > { %s1465_s30 = sshll.u32 (!%p1873_p8), %s1941_s15, 10  ;;  %s250_s26 = scalar_lea.sflag (!%p1873_p8), [#allocation3], %s1941_s15 }
  0x2f   : > { %s1945_s28 = scalar_lea.vmem (!%p1873_p8), [#allocation2], %s1465_s30 }
  0x32   : > { %1760 = dma.done.wait (%p1860_p4), %s250_s26, 16384  }
  0x33   : > { %1762 = vsyncadd (%p1860_p4), %s250_s26, 4294950912 }
  0x34   : > { %1764 = dma.done.wait (%p44_p1), [#allocation6], 10240  }
  0x35   : > { %1766 = vsyncadd (%p44_p1), [#allocation6], 4294957056 }
  0x36   : > { %1768 = dma.done.wait (%p44_p1), [#allocation9], 2048  }
  0x37   : > { %1770 = vsyncadd (%p44_p1), [#allocation9], 4294965248  ;;  %v441_v0 = vld [vmem:[#allocation5 + $0x78] sm:$0xff]  ;;  %v440_v2 = vld [vmem:[#allocation5 + $0x70] sm:$0xff]  ;;  %s1470_s24 = sshll.u32 %s1851_s22, 8  ;;  %s1469_s17 = sshll.u32 %s1941_s15, 8 }
  0x38   : > { %v457_v1 = vld [vmem:[#allocation5 + $0xf8] sm:$0xff]  ;;  %1479 = vmatpush.msra.mxu2 %v441_v0  ;;  %v456_v3 = vld [vmem:[#allocation5 + $0xf0] sm:$0xff]  ;;  %v439_v4 = vld [vmem:[#allocation5 + $0x68] sm:$0xff]  ;;  %490 = vmatpush.msra.mxu0 %v441_v0  ;;  %s2080_s29 = scalar_lea.vmem [#allocation5], %s1470_s24  ;;  %s2153_s23 = scalar_lea.vmem [#allocation10], %s1469_s17 }
  0x39   : > { %1495 = vmatpush.msra.mxu3 %v457_v1  ;;  %v455_v5 = vld [vmem:[#allocation5 + $0xe8] sm:$0xff]  ;;  %603 = vmatpush.msra.mxu1 %v457_v1  ;;  %v438_v6 = vld [vmem:[#allocation5 + $0x60] sm:$0xff]  ;;  %v437_v8 = vld [vmem:[#allocation5 + $0x58] sm:$0xff]  ;;  %s1346_s13 = scalar_lea.hbm %s2284_s5, %s1470_s24  ;;  %s1347_s9 = sshll.u32 %s2153_s23, 4  ;;  %s1348_s9 = int_to_ptr.vmem [resolvable:$true] %s1347_s9 }
  0x3a   : > { %1480 = vmatpush.msra.mxu2 %v440_v2  ;;  %v454_v7 = vld [vmem:[#allocation5 + $0xe0] sm:$0xff]  ;;  %491 = vmatpush.msra.mxu0 %v440_v2  ;;  %v453_v9 = vld [vmem:[#allocation5 + $0xd8] sm:$0xff]  ;;  %v436_v10 = vld [vmem:[#allocation5 + $0x50] sm:$0xff]  ;;  %s1349_s11 = sshll.u32 %s1346_s13, 4  ;;  %s1335_s12 = scalar_lea.sflag [#allocation4], %s1941_s15  ;;  %s1350_s11 = int_to_ptr.hbm [resolvable:$true] %s1349_s11 }
  0x3b   : > { %1496 = vmatpush.msra.mxu3 %v456_v3  ;;  %604 = vmatpush.msra.mxu1 %v456_v3  ;;  %v452_v11 = vld [vmem:[#allocation5 + $0xd0] sm:$0xff]  ;;  %v435_v12 = vld [vmem:[#allocation5 + $0x48] sm:$0xff]  ;;  %v434_v14 = vld [vmem:[#allocation5 + $0x40] sm:$0xff]  ;;  %s1729_s22 = sshra.s32 %s1350_s11, 4  ;;  %s1735_s24 = scalar_lea.hbm %s2284_s5, 512  ;;  %s1730_s22 = int_to_ptr.hbm [resolvable:$true] %s1729_s22 }
  0x3c   : > { %1481 = vmatpush.msra.mxu2 %v439_v4  ;;  %492 = vmatpush.msra.mxu0 %v439_v4  ;;  %v451_v13 = vld [vmem:[#allocation5 + $0xc8] sm:$0xff]  ;;  %v450_v15 = vld [vmem:[#allocation5 + $0xc0] sm:$0xff]  ;;  %v433_v16 = vld [vmem:[#allocation5 + $0x38] sm:$0xff]  ;;  %s1731_s30 = scalar_lea.hbm %s1730_s22, 256  ;;  %p1736_p11 = scmp.lt.s32.totalorder %s1730_s22, %s2284_s5 }
  0x3d   : > { %1497 = vmatpush.msra.mxu3 %v455_v5  ;;  %605 = vmatpush.msra.mxu1 %v455_v5  ;;  %v449_v17 = vld [vmem:[#allocation5 + $0xb8] sm:$0xff]  ;;  %v432_v18 = vld [vmem:[#allocation5 + $0x30] sm:$0xff]  ;;  %v431_v20 = vld [vmem:[#allocation5 + $0x28] sm:$0xff]  ;;  %p1732_p1 = scmp.ne.s32.totalorder %s1730_s22, %s1731_s30  ;;  %p1737_p9 = scmp.lt.s32.totalorder %s1735_s24, %s1731_s30 }
  0x3e   : > { %1482 = vmatpush.msra.mxu2 %v438_v6  ;;  %493 = vmatpush.msra.mxu0 %v438_v6  ;;  %v448_v19 = vld [vmem:[#allocation5 + $0xb0] sm:$0xff]  ;;  %v447_v21 = vld [vmem:[#allocation5 + $0xa8] sm:$0xff]  ;;  %v430_v22 = vld [vmem:[#allocation5 + $0x20] sm:$0xff] }
  0x3f   : > { %1498 = vmatpush.msra.mxu3 %v454_v7  ;;  %606 = vmatpush.msra.mxu1 %v454_v7  ;;  %v446_v23 = vld [vmem:[#allocation5 + $0xa0] sm:$0xff]  ;;  %v429_v24 = vld [vmem:[#allocation5 + $0x18] sm:$0xff]  ;;  %v428_v26 = vld [vmem:[#allocation5 + $0x10] sm:$0xff]  ;;  %p1733_p4 = pnand %p1732_p1, %p1913_p7  ;;  %p1738_p2 = por %p1737_p9, %p1736_p11 }
  0x40   : > { %1483 = vmatpush.msra.mxu2 %v437_v8  ;;  %494 = vmatpush.msra.mxu0 %v437_v8  ;;  %v445_v25 = vld [vmem:[#allocation5 + $0x98] sm:$0xff]  ;;  %v444_v27 = vld [vmem:[#allocation5 + $0x90] sm:$0xff]  ;;  %v427_v28 = vld [vmem:[#allocation5 + $0x8] sm:$0xff] }
  0x41   : > { %1499 = vmatpush.msra.mxu3 %v453_v9  ;;  %607 = vmatpush.msra.mxu1 %v453_v9  ;;  %v443_v29 = vld [vmem:[#allocation5 + $0x88] sm:$0xff]  ;;  %v426_v30 = vld [vmem:[#allocation5] sm:$0xff]  ;;  %v473_v34 = vld [vmem:[#allocation5 + $0x178] sm:$0xff]  ;;  %p1734_p8 = pneg %p1733_p4 }
  0x42   : > { %1484 = vmatpush.msra.mxu2 %v436_v10  ;;  %495 = vmatpush.msra.mxu0 %v436_v10  ;;  %v442_v31 = vld [vmem:[#allocation5 + $0x80] sm:$0xff]  ;;  %v363_v33 = vld [vmem:[%s1945_s28 + $0x208] sm:$0xff]  ;;  %v489_v35 = vld [vmem:[#allocation5 + $0x1f8] sm:$0xff] }
  0x43   : > { %1500 = vmatpush.msra.mxu3 %v452_v11  ;;  %608 = vmatpush.msra.mxu1 %v452_v11  ;;  %v362_v32 = vld [vmem:[%s1945_s28 + $0x200] sm:$0xff]  ;;  %v472_v36 = vld [vmem:[#allocation5 + $0x170] sm:$0xff]  ;;  %v471_v38 = vld [vmem:[#allocation5 + $0x168] sm:$0xff]  ;;  %p1739_p10 = pnand %p1738_p2, %p1734_p8 }
  0x44   : > { %1485 = vmatpush.msra.mxu2 %v435_v12  ;;  %496 = vmatpush.msra.mxu0 %v435_v12  ;;  %v488_v37 = vld [vmem:[#allocation5 + $0x1f0] sm:$0xff]  ;;  %v487_v39 = vld [vmem:[#allocation5 + $0x1e8] sm:$0xff]  ;;  %v470_v40 = vld [vmem:[#allocation5 + $0x160] sm:$0xff] }
  0x45   : > { %1501 = vmatpush.msra.mxu3 %v451_v13  ;;  %609 = vmatpush.msra.mxu1 %v451_v13  ;;  %v486_v41 = vld [vmem:[#allocation5 + $0x1e0] sm:$0xff]  ;;  %v367_v43 = vld [vmem:[%s1945_s28 + $0x228] sm:$0xff]  ;;  %v469_v44 = vld [vmem:[#allocation5 + $0x158] sm:$0xff] }
  0x46   : > { %1486 = vmatpush.msra.mxu2 %v434_v14  ;;  %497 = vmatpush.msra.mxu0 %v434_v14  ;;  %v366_v42 = vld [vmem:[%s1945_s28 + $0x220] sm:$0xff]  ;;  %v485_v45 = vld [vmem:[#allocation5 + $0x1d8] sm:$0xff]  ;;  %v468_v46 = vld [vmem:[#allocation5 + $0x150] sm:$0xff] }
  0x47   : > { %1502 = vmatpush.msra.mxu3 %v450_v15  ;;  %610 = vmatpush.msra.mxu1 %v450_v15  ;;  %v484_v47 = vld [vmem:[#allocation5 + $0x1d0] sm:$0xff]  ;;  %v370_v48 = vld [vmem:[%s1945_s28 + $0x240] sm:$0xff]  ;;  %v371_v49 = vld [vmem:[%s1945_s28 + $0x248] sm:$0xff] }
  0x48   : > { %1487 = vmatpush.msra.mxu2 %v433_v16  ;;  %498 = vmatpush.msra.mxu0 %v433_v16  ;;  %v467_v50 = vld [vmem:[#allocation5 + $0x148] sm:$0xff]  ;;  %v374_v52 = vld [vmem:[%s1945_s28 + $0x260] sm:$0xff]  ;;  %v465_v58 = vld [vmem:[#allocation5 + $0x138] sm:$0xff] }
  0x49   : > { %1503 = vmatpush.msra.mxu3 %v449_v17  ;;  %611 = vmatpush.msra.mxu1 %v449_v17  ;;  %v483_v51 = vld [vmem:[#allocation5 + $0x1c8] sm:$0xff]  ;;  %v466_v54 = vld [vmem:[#allocation5 + $0x140] sm:$0xff]  ;;  %v481_v59 = vld [vmem:[#allocation5 + $0x1b8] sm:$0xff] }
  0x4a   : > { %1488 = vmatpush.msra.mxu2 %v432_v18  ;;  %499 = vmatpush.msra.mxu0 %v432_v18  ;;  %v375_v53 = vld [vmem:[%s1945_s28 + $0x268] sm:$0xff]  ;;  %v482_v55 = vld [vmem:[#allocation5 + $0x1c0] sm:$0xff]  ;;  %v464_v62 = vld [vmem:[#allocation5 + $0x130] sm:$0xff] }
  0x4b   : > { %1504 = vmatpush.msra.mxu3 %v448_v19  ;;  %612 = vmatpush.msra.mxu1 %v448_v19  ;;  %v378_v56 = vld [vmem:[%s1945_s28 + $0x280] sm:$0xff]  ;;  %v379_v57 = vld [vmem:[%s1945_s28 + $0x288] sm:$0xff]  ;;  %v480_v63 = vld [vmem:[#allocation5 + $0x1b0] sm:$0xff] }
  0x4c   : > { %1489 = vmatpush.msra.mxu2 %v431_v20  ;;  %500 = vmatpush.msra.mxu0 %v431_v20  ;;  %v382_v60 = vld [vmem:[%s1945_s28 + $0x2a0] sm:$0xff]  ;;  %v383_v61 = vld [vmem:[%s1945_s28 + $0x2a8] sm:$0xff]  ;;  %v461_v10 = vld [vmem:[#allocation5 + $0x118] sm:$0xff] }
  0x4d   : > { %1505 = vmatpush.msra.mxu3 %v447_v21  ;;  %613 = vmatpush.msra.mxu1 %v447_v21  ;;  %v386_v0 = vld [vmem:[%s1945_s28 + $0x2c0] sm:$0xff]  ;;  %v387_v1 = vld [vmem:[%s1945_s28 + $0x2c8] sm:$0xff]  ;;  %v477_v11 = vld [vmem:[#allocation5 + $0x198] sm:$0xff] }
  0x4e   : > { %1490 = vmatpush.msra.mxu2 %v430_v22  ;;  %501 = vmatpush.msra.mxu0 %v430_v22  ;;  %v463_v2 = vld [vmem:[#allocation5 + $0x128] sm:$0xff]  ;;  %v390_v4 = vld [vmem:[%s1945_s28 + $0x2e0] sm:$0xff]  ;;  %v460_v14 = vld [vmem:[#allocation5 + $0x110] sm:$0xff] }
  0x4f   : > { %1506 = vmatpush.msra.mxu3 %v446_v23  ;;  %614 = vmatpush.msra.mxu1 %v446_v23  ;;  %v479_v3 = vld [vmem:[#allocation5 + $0x1a8] sm:$0xff]  ;;  %v462_v6 = vld [vmem:[#allocation5 + $0x120] sm:$0xff]  ;;  %v476_v15 = vld [vmem:[#allocation5 + $0x190] sm:$0xff] }
  0x50   : > { %1491 = vmatpush.msra.mxu2 %v429_v24  ;;  %502 = vmatpush.msra.mxu0 %v429_v24  ;;  %v391_v5 = vld [vmem:[%s1945_s28 + $0x2e8] sm:$0xff]  ;;  %v478_v7 = vld [vmem:[#allocation5 + $0x1a0] sm:$0xff] }
  0x51   : > { %1507 = vmatpush.msra.mxu3 %v445_v25  ;;  %615 = vmatpush.msra.mxu1 %v445_v25  ;;  %v394_v8 = vld [vmem:[%s1945_s28 + $0x300] sm:$0xff]  ;;  %v395_v9 = vld [vmem:[%s1945_s28 + $0x308] sm:$0xff] }
  0x52   : > { %1492 = vmatpush.msra.mxu2 %v428_v26  ;;  %503 = vmatpush.msra.mxu0 %v428_v26  ;;  %v398_v12 = vld [vmem:[%s1945_s28 + $0x320] sm:$0xff]  ;;  %v399_v13 = vld [vmem:[%s1945_s28 + $0x328] sm:$0xff] }
  0x53   : > { %1508 = vmatpush.msra.mxu3 %v444_v27  ;;  %616 = vmatpush.msra.mxu1 %v444_v27  ;;  %v402_v16 = vld [vmem:[%s1945_s28 + $0x340] sm:$0xff]  ;;  %v403_v17 = vld [vmem:[%s1945_s28 + $0x348] sm:$0xff] }
  0x54   : > { %1493 = vmatpush.msra.mxu2 %v427_v28  ;;  %504 = vmatpush.msra.mxu0 %v427_v28  ;;  %v459_v18 = vld [vmem:[#allocation5 + $0x108] sm:$0xff]  ;;  %v406_v20 = vld [vmem:[%s1945_s28 + $0x360] sm:$0xff] }
  0x55   : > { %1509 = vmatpush.msra.mxu3 %v443_v29  ;;  %617 = vmatpush.msra.mxu1 %v443_v29  ;;  %v475_v19 = vld [vmem:[#allocation5 + $0x188] sm:$0xff]  ;;  %v458_v22 = vld [vmem:[#allocation5 + $0x100] sm:$0xff] }
  0x56   : > { %1494 = vmatpush.msra.mxu2 %v426_v30  ;;  %505 = vmatpush.msra.mxu0 %v426_v30  ;;  %v407_v21 = vld [vmem:[%s1945_s28 + $0x368] sm:$0xff]  ;;  %v474_v23 = vld [vmem:[#allocation5 + $0x180] sm:$0xff]  ;;  %v1007_v30 = vld [vmem:[#allocation8 + $0x78] sm:$0xff] }
  0x57   : > { %1510 = vmatpush.msra.mxu3 %v442_v31  ;;  %554 = vmatmul.f32.vlgmr.msra.gmra.mxu2 %v362_v32  ;;  %v410_v24 = vld [vmem:[%s1945_s28 + $0x380] sm:$0xff]  ;;  %v411_v25 = vld [vmem:[%s1945_s28 + $0x388] sm:$0xff] }
  0x58   : > { %667 = vmatmul.f32.vlgmr.msra.gmra.mxu3 %v363_v33  ;;  %716 = vmatpush.msrb.mxu2 %v473_v34  ;;  %v298_v26 = vld [vmem:[%s1945_s28] sm:$0xff]  ;;  %v299_v27 = vld [vmem:[%s1945_s28 + $0x8] sm:$0xff] }
  0x59   : > { %829 = vmatpush.msrb.mxu3 %v489_v35  ;;  %618 = vmatpush.msra.mxu1 %v442_v31  ;;  %v414_v28 = vld [vmem:[%s1945_s28 + $0x3a0] sm:$0xff]  ;;  %v415_v29 = vld [vmem:[%s1945_s28 + $0x3a8] sm:$0xff]  ;;  %v991_v31 = vld [vmem:[#allocation7 + $0x78] sm:$0xff] }
  0x5a   : > { %717 = vmatpush.msrb.mxu2 %v472_v36  ;;  %506 = vmatmul.f32.vlgmr.msra.gmra.mxu0 %v298_v26  ;;  %v302_v32 = vld [vmem:[%s1945_s28 + $0x20] sm:$0xff]  ;;  %v303_v33 = vld [vmem:[%s1945_s28 + $0x28] sm:$0xff]  ;;  %v1006_v36 = vld [vmem:[#allocation8 + $0x70] sm:$0xff] }
  0x5b   : > { %830 = vmatpush.msrb.mxu3 %v488_v37  ;;  %619 = vmatmul.f32.vlgmr.msra.gmra.mxu1 %v299_v27  ;;  %v418_v34 = vld [vmem:[%s1945_s28 + $0x3c0] sm:$0xff]  ;;  %v419_v35 = vld [vmem:[%s1945_s28 + $0x3c8] sm:$0xff]  ;;  %v990_v37 = vld [vmem:[#allocation7 + $0x70] sm:$0xff] }
  0x5c   : > { %718 = vmatpush.msrb.mxu2 %v471_v38  ;;  %1008 = vmatpush.msrb.mxu0 %v1007_v30  ;;  %v306_v38 = vld [vmem:[%s1945_s28 + $0x40] sm:$0xff]  ;;  %v320_v27 = vld [vmem:[%s1945_s28 + $0xb0] sm:$0xff]  ;;  %v983_v30 = vld [vmem:[#allocation7 + $0x38] sm:$0xff] }
  0x5d   : > { %831 = vmatpush.msrb.mxu3 %v487_v39  ;;  %1121 = vmatpush.msrb.mxu1 %v991_v31  ;;  %v307_v39 = vld [vmem:[%s1945_s28 + $0x48] sm:$0xff] }
  0x5e   : > { %719 = vmatpush.msrb.mxu2 %v470_v40  ;;  %1009 = vmatpush.msrb.mxu0 %v1006_v36  ;;  %v422_v40 = vld [vmem:[%s1945_s28 + $0x3e0] sm:$0xff]  ;;  %v324_v36 = vld [vmem:[%s1945_s28 + $0xd0] sm:$0xff] }
  0x5f   : > { %832 = vmatpush.msrb.mxu3 %v486_v41  ;;  %557 = vmatmul.f32.gmra.mxu2 %v366_v42  ;;  %v423_v41 = vld [vmem:[%s1945_s28 + $0x3e8] sm:$0xff] }
  0x60   : > { %670 = vmatmul.f32.gmra.mxu3 %v367_v43  ;;  %720 = vmatpush.msrb.mxu2 %v469_v44  ;;  %v1005_v42 = vld [vmem:[#allocation8 + $0x68] sm:$0xff]  ;;  %v310_v44 = vld [vmem:[%s1945_s28 + $0x60] sm:$0xff] }
  0x61   : > { %833 = vmatpush.msrb.mxu3 %v485_v45  ;;  %1122 = vmatpush.msrb.mxu1 %v990_v37  ;;  %v989_v43 = vld [vmem:[#allocation7 + $0x68] sm:$0xff]  ;;  %v325_v37 = vld [vmem:[%s1945_s28 + $0xd8] sm:$0xff] }
  0x62   : > { %721 = vmatpush.msrb.mxu2 %v468_v46  ;;  %509 = vmatmul.f32.gmra.mxu0 %v302_v32  ;;  %v311_v45 = vld [vmem:[%s1945_s28 + $0x68] sm:$0xff]  ;;  %v300_v46 = vld [vmem:[%s1945_s28 + $0x10] sm:$0xff] }
  0x63   : > { %834 = vmatpush.msrb.mxu3 %v484_v47  ;;  %622 = vmatmul.f32.gmra.mxu1 %v303_v33  ;;  %v301_v47 = vld [vmem:[%s1945_s28 + $0x18] sm:$0xff]  ;;  %v334_v33 = vld [vmem:[%s1945_s28 + $0x120] sm:$0xff] }
  0x64   : > { %722 = vmatpush.msrb.mxu2 %v467_v50  ;;  %1010 = vmatpush.msrb.mxu0 %v1005_v42  ;;  %v338_v42 = vld [vmem:[%s1945_s28 + $0x140] sm:$0xff] }
  0x65   : > { %835 = vmatpush.msrb.mxu3 %v483_v51  ;;  %1123 = vmatpush.msrb.mxu1 %v989_v43  ;;  %v339_v43 = vld [vmem:[%s1945_s28 + $0x148] sm:$0xff] }
  0x66   : > { %723 = vmatpush.msrb.mxu2 %v466_v54 }
  0x67   : > { %560 = vmatmul.f32.gmra.mxu2 %v370_v48  ;;  %836 = vmatpush.msrb.mxu3 %v482_v55  ;;  %v1004_v48 = vld [vmem:[#allocation8 + $0x60] sm:$0xff]  ;;  %v304_v55 = vld [vmem:[%s1945_s28 + $0x30] sm:$0xff] }
  0x68   : > { %673 = vmatmul.f32.gmra.mxu3 %v371_v49  ;;  %724 = vmatpush.msrb.mxu2 %v465_v58  ;;  %v988_v49 = vld [vmem:[#allocation7 + $0x60] sm:$0xff]  ;;  %v987_v58 = vld [vmem:[#allocation7 + $0x58] sm:$0xff] }
  0x69   : > { %837 = vmatpush.msrb.mxu3 %v481_v59  ;;  %1011 = vmatpush.msrb.mxu0 %v1004_v48  ;;  %v981_v48 = vld [vmem:[#allocation7 + $0x28] sm:$0xff] }
  0x6a   : > { %725 = vmatpush.msrb.mxu2 %v464_v62  ;;  %512 = vmatmul.f32.gmra.mxu0 %v306_v38  ;;  %v319_v62 = vld [vmem:[%s1945_s28 + $0xa8] sm:$0xff]  ;;  %v998_v38 = vld [vmem:[#allocation8 + $0x30] sm:$0xff] }
  0x6b   : > { %838 = vmatpush.msrb.mxu3 %v480_v63  ;;  %625 = vmatmul.f32.gmra.mxu1 %v307_v39  ;;  %v982_v39 = vld [vmem:[#allocation7 + $0x30] sm:$0xff] }
  0x6c   : > { %726 = vmatpush.msrb.mxu2 %v463_v2  ;;  %1124 = vmatpush.msrb.mxu1 %v988_v49  ;;  %v1002_v2 = vld [vmem:[#allocation8 + $0x50] sm:$0xff] }
  0x6d   : > { %839 = vmatpush.msrb.mxu3 %v479_v3  ;;  %v986_v3 = vld [vmem:[#allocation7 + $0x50] sm:$0xff] }
  0x6e   : > { %727 = vmatpush.msrb.mxu2 %v462_v6  ;;  %1125 = vmatpush.msrb.mxu1 %v987_v58  ;;  %v322_v6 = vld [vmem:[%s1945_s28 + $0xc0] sm:$0xff] }
  0x6f   : > { %563 = vmatmul.f32.gmra.mxu2 %v374_v52  ;;  %840 = vmatpush.msrb.mxu3 %v478_v7  ;;  %v314_v52 = vld [vmem:[%s1945_s28 + $0x80] sm:$0xff]  ;;  %v323_v7 = vld [vmem:[%s1945_s28 + $0xc8] sm:$0xff] }
  0x70   : > { %676 = vmatmul.f32.gmra.mxu3 %v375_v53  ;;  %728 = vmatpush.msrb.mxu2 %v461_v10  ;;  %v315_v53 = vld [vmem:[%s1945_s28 + $0x88] sm:$0xff]  ;;  %v313_v10 = vld [vmem:[%s1945_s28 + $0x78] sm:$0xff]  ;;  %v980_v58 = vld [vmem:[#allocation7 + $0x20] sm:$0xff] }
  0x71   : > { %841 = vmatpush.msrb.mxu3 %v477_v11  ;;  %1126 = vmatpush.msrb.mxu1 %v986_v3  ;;  %v1001_v11 = vld [vmem:[#allocation8 + $0x48] sm:$0xff]  ;;  %v995_v3 = vld [vmem:[#allocation8 + $0x18] sm:$0xff] }
  0x72   : > { %729 = vmatpush.msrb.mxu2 %v460_v14  ;;  %515 = vmatmul.f32.gmra.mxu0 %v310_v44 }
  0x73   : > { %842 = vmatpush.msrb.mxu3 %v476_v15  ;;  %628 = vmatmul.f32.gmra.mxu1 %v311_v45  ;;  %v326_v15 = vld [vmem:[%s1945_s28 + $0xe0] sm:$0xff]  ;;  %v328_v45 = vld [vmem:[%s1945_s28 + $0xf0] sm:$0xff] }
  0x74   : > { %730 = vmatpush.msrb.mxu2 %v459_v18  ;;  %v316_v18 = vld [vmem:[%s1945_s28 + $0x90] sm:$0xff] }
  0x75   : > { %843 = vmatpush.msrb.mxu3 %v475_v19  ;;  %v317_v19 = vld [vmem:[%s1945_s28 + $0x98] sm:$0xff] }
  0x76   : > { %731 = vmatpush.msrb.mxu2 %v458_v22 }
  0x77   : > { %566 = vmatmul.f32.gmra.mxu2 %v378_v56  ;;  %844 = vmatpush.msrb.mxu3 %v474_v23  ;;  %v305_v56 = vld [vmem:[%s1945_s28 + $0x38] sm:$0xff] }
  0x78   : > { %679 = vmatmul.f32.gmra.mxu3 %v379_v57  ;;  %v1003_v57 = vld [vmem:[#allocation8 + $0x58] sm:$0xff] }
  0x79   : > { %1012 = vmatpush.msrb.mxu0 %v1003_v57  ;;  %v996_v57 = vld [vmem:[#allocation8 + $0x20] sm:$0xff] }
  0x7a   : > { %518 = vmatmul.f32.gmra.mxu0 %v314_v52  ;;  %v343_v52 = vld [vmem:[%s1945_s28 + $0x168] sm:$0xff] }
  0x7b   : > { %631 = vmatmul.f32.gmra.mxu1 %v315_v53  ;;  %1013 = vmatpush.msrb.mxu0 %v1002_v2  ;;  %v337_v2 = vld [vmem:[%s1945_s28 + $0x138] sm:$0xff] }
  0x7d   : > { %1014 = vmatpush.msrb.mxu0 %v1001_v11  ;;  %v340_v11 = vld [vmem:[%s1945_s28 + $0x150] sm:$0xff] }
  0x7f   : > { %569 = vmatmul.f32.gmra.mxu2 %v382_v60 }
  0x80   : > { %682 = vmatmul.f32.gmra.mxu3 %v383_v61  ;;  %v318_v61 = vld [vmem:[%s1945_s28 + $0xa0] sm:$0xff] }
  0x82   : > { %521 = vmatmul.f32.gmra.mxu0 %v318_v61  ;;  %v346_v61 = vld [vmem:[%s1945_s28 + $0x180] sm:$0xff] }
  0x83   : > { %634 = vmatmul.f32.gmra.mxu1 %v319_v62  ;;  %v347_v62 = vld [vmem:[%s1945_s28 + $0x188] sm:$0xff] }
  0x87   : > { %572 = vmatmul.f32.gmra.mxu2 %v386_v0  ;;  %v308_v0 = vld [vmem:[%s1945_s28 + $0x50] sm:$0xff] }
  0x88   : > { %685 = vmatmul.f32.gmra.mxu3 %v387_v1  ;;  %v309_v1 = vld [vmem:[%s1945_s28 + $0x58] sm:$0xff] }
  0x8a   : > { %524 = vmatmul.f32.gmra.mxu0 %v322_v6 }
  0x8b   : > { %637 = vmatmul.f32.gmra.mxu1 %v323_v7  ;;  %v350_v7 = vld [vmem:[%s1945_s28 + $0x1a0] sm:$0xff] }
  0x8f   : > { %575 = vmatmul.f32.gmra.mxu2 %v390_v4 }
  0x90   : > { %688 = vmatmul.f32.gmra.mxu3 %v391_v5 }
  0x92   : > { %527 = vmatmul.f32.gmra.mxu0 %v326_v15 }
  0x97   : > { %578 = vmatmul.f32.gmra.mxu2 %v394_v8 }
  0x98   : > { %691 = vmatmul.f32.gmra.mxu3 %v395_v9  ;;  %v312_v9 = vld [vmem:[%s1945_s28 + $0x70] sm:$0xff] }
  0x9f   : > { %581 = vmatmul.f32.gmra.mxu2 %v398_v12  ;;  %v985_v12 = vld [vmem:[#allocation7 + $0x48] sm:$0xff] }
  0xa0   : > { %694 = vmatmul.f32.gmra.mxu3 %v399_v13  ;;  %1127 = vmatpush.msrb.mxu1 %v985_v12  ;;  %v341_v12 = vld [vmem:[%s1945_s28 + $0x158] sm:$0xff] }
  0xa7   : > { %584 = vmatmul.f32.gmra.mxu2 %v402_v16  ;;  %v327_v16 = vld [vmem:[%s1945_s28 + $0xe8] sm:$0xff] }
  0xa8   : > { %697 = vmatmul.f32.gmra.mxu3 %v403_v17  ;;  %640 = vmatmul.f32.gmra.mxu1 %v327_v16 }
  0xaf   : > { %587 = vmatmul.f32.gmra.mxu2 %v406_v20  ;;  %v1000_v20 = vld [vmem:[#allocation8 + $0x40] sm:$0xff] }
  0xb0   : > { %700 = vmatmul.f32.gmra.mxu3 %v407_v21  ;;  %v984_v21 = vld [vmem:[#allocation7 + $0x40] sm:$0xff]  ;;  %1015 = vmatpush.msrb.mxu0 %v1000_v20 }
  0xb1   : > { %1128 = vmatpush.msrb.mxu1 %v984_v21  ;;  %v344_v21 = vld [vmem:[%s1945_s28 + $0x170] sm:$0xff] }
  0xb3   : > { %1129 = vmatpush.msrb.mxu1 %v983_v30 }
  0xb5   : > { %1130 = vmatpush.msrb.mxu1 %v982_v39 }
  0xb7   : > { %590 = vmatmul.f32.gmra.mxu2 %v410_v24  ;;  %v330_v24 = vld [vmem:[%s1945_s28 + $0x100] sm:$0xff]  ;;  %1131 = vmatpush.msrb.mxu1 %v981_v48 }
  0xb8   : > { %703 = vmatmul.f32.gmra.mxu3 %v411_v25  ;;  %v331_v25 = vld [vmem:[%s1945_s28 + $0x108] sm:$0xff]  ;;  %530 = vmatmul.f32.gmra.mxu0 %v330_v24 }
  0xb9   : > { %643 = vmatmul.f32.gmra.mxu1 %v331_v25  ;;  %v977_v24 = vld [vmem:[#allocation7 + $0x8] sm:$0xff] }
  0xba   : > { %1132 = vmatpush.msrb.mxu1 %v980_v58 }
  0xbf   : > { %593 = vmatmul.f32.gmra.mxu2 %v414_v28  ;;  %v321_v28 = vld [vmem:[%s1945_s28 + $0xb8] sm:$0xff] }
  0xc0   : > { %706 = vmatmul.f32.gmra.mxu3 %v415_v29  ;;  %v999_v29 = vld [vmem:[#allocation8 + $0x38] sm:$0xff]  ;;  %533 = vmatmul.f32.gmra.mxu0 %v334_v33  ;;  %v992_v33 = vld [vmem:[#allocation8] sm:$0xff] }
  0xc1   : > { %1016 = vmatpush.msrb.mxu0 %v999_v29  ;;  %v359_v29 = vld [vmem:[%s1945_s28 + $0x1e8] sm:$0xff] }
  0xc3   : > { %1017 = vmatpush.msrb.mxu0 %v998_v38 }
  0xc7   : > { %596 = vmatmul.f32.gmra.mxu2 %v418_v34  ;;  %v335_v34 = vld [vmem:[%s1945_s28 + $0x128] sm:$0xff] }
  0xc8   : > { %709 = vmatmul.f32.gmra.mxu3 %v419_v35  ;;  %646 = vmatmul.f32.gmra.mxu1 %v335_v34  ;;  %v976_v34 = vld [vmem:[#allocation7] sm:$0xff] }
  0xc9   : > { %536 = vmatmul.f32.gmra.mxu0 %v338_v42  ;;  %v353_v42 = vld [vmem:[%s1945_s28 + $0x1b8] sm:$0xff] }
  0xcf   : > { %599 = vmatmul.f32.gmra.mxu2 %v422_v40 }
  0xd0   : > { %712 = vmatmul.f32.gmra.mxu3 %v423_v41  ;;  %649 = vmatmul.f32.gmra.mxu1 %v339_v43  ;;  %v944_v43 = vld [vmem:[%s2080_s29] sm:$0xff] }
  0xd7   : > { %732 = vmatmul.f32.vlgmr.msrb.gmra.mxu2 %v300_v46  ;;  %v329_v46 = vld [vmem:[%s1945_s28 + $0xf8] sm:$0xff] }
  0xd8   : > { %845 = vmatmul.f32.vlgmr.msrb.gmra.mxu3 %v301_v47  ;;  %v997_v47 = vld [vmem:[#allocation8 + $0x28] sm:$0xff]  ;;  %652 = vmatmul.f32.gmra.mxu1 %v343_v52 }
  0xd9   : > { %1018 = vmatpush.msrb.mxu0 %v997_v47  ;;  %v945_v52 = vld [vmem:[%s2080_s29 + $0x8] sm:$0xff] }
  0xda   : > { %v555_v50 = vpop.f32.mrf.mxu2 }
  0xdb   : > { %v668_v51 = vpop.f32.mrf.mxu3  ;;  %1019 = vmatpush.msrb.mxu0 %v996_v57 }
  0xdc   : > { %v2003_v54 = vadd.f32 %v668_v51, %v555_v50  ;;  %v342_v51 = vld [vmem:[%s1945_s28 + $0x160] sm:$0xff] }
  0xdd   : > { %539 = vmatmul.f32.gmra.mxu0 %v342_v51  ;;  %v357_v51 = vld [vmem:[%s1945_s28 + $0x1d8] sm:$0xff] }
  0xde   : > { %1020 = vmatpush.msrb.mxu0 %v995_v3 }
  0xdf   : > { %735 = vmatmul.f32.gmra.mxu2 %v304_v55  ;;  %v332_v55 = vld [vmem:[%s1945_s28 + $0x110] sm:$0xff] }
  0xe0   : > { %848 = vmatmul.f32.gmra.mxu3 %v305_v56  ;;  %v333_v56 = vld [vmem:[%s1945_s28 + $0x118] sm:$0xff]  ;;  %655 = vmatmul.f32.gmra.mxu1 %v347_v62  ;;  %v946_v62 = vld [vmem:[%s2080_s29 + $0x10] sm:$0xff] }
  0xe2   : > { %v558_v59 = vpop.f32.mrf.mxu2 }
  0xe3   : > { %v671_v60 = vpop.f32.mrf.mxu3 }
  0xe4   : > { %v2009_v63 = vadd.f32 %v671_v60, %v558_v59 }
  0xe5   : > { %542 = vmatmul.f32.gmra.mxu0 %v346_v61  ;;  %v361_v61 = vld [vmem:[%s1945_s28 + $0x1f8] sm:$0xff] }
  0xe7   : > { %738 = vmatmul.f32.gmra.mxu2 %v308_v0 }
  0xe8   : > { %851 = vmatmul.f32.gmra.mxu3 %v309_v1  ;;  %v336_v1 = vld [vmem:[%s1945_s28 + $0x130] sm:$0xff] }
  0xea   : > { %v561_v4 = vpop.f32.mrf.mxu2 }
  0xeb   : > { %v674_v5 = vpop.f32.mrf.mxu3 }
  0xec   : > { %v2015_v8 = vadd.f32 %v674_v5, %v561_v4  ;;  %v979_v4 = vld [vmem:[#allocation7 + $0x18] sm:$0xff] }
  0xed   : > { %1133 = vmatpush.msrb.mxu1 %v979_v4  ;;  %545 = vmatmul.f32.gmra.mxu0 %v350_v7  ;;  %v365_v7 = vld [vmem:[%s1945_s28 + $0x218] sm:$0xff] }
  0xef   : > { %741 = vmatmul.f32.gmra.mxu2 %v312_v9  ;;  %v351_v9 = vld [vmem:[%s1945_s28 + $0x1a8] sm:$0xff] }
  0xf0   : > { %854 = vmatmul.f32.gmra.mxu3 %v313_v10  ;;  %658 = vmatmul.f32.gmra.mxu1 %v351_v9  ;;  %v947_v9 = vld [vmem:[%s2080_s29 + $0x18] sm:$0xff] }
  0xf2   : > { %v564_v13 = vpop.f32.mrf.mxu2 }
  0xf3   : > { %v677_v14 = vpop.f32.mrf.mxu3 }
  0xf4   : > { %v2021_v17 = vadd.f32 %v677_v14, %v564_v13  ;;  %v994_v13 = vld [vmem:[#allocation8 + $0x10] sm:$0xff] }
  0xf5   : > { %v978_v14 = vld [vmem:[#allocation7 + $0x10] sm:$0xff]  ;;  %1021 = vmatpush.msrb.mxu0 %v994_v13 }
  0xf6   : > { %1134 = vmatpush.msrb.mxu1 %v978_v14 }
  0xf7   : > { %744 = vmatmul.f32.gmra.mxu2 %v316_v18  ;;  %v354_v18 = vld [vmem:[%s1945_s28 + $0x1c0] sm:$0xff] }
  0xf8   : > { %857 = vmatmul.f32.gmra.mxu3 %v317_v19  ;;  %v355_v19 = vld [vmem:[%s1945_s28 + $0x1c8] sm:$0xff]  ;;  %548 = vmatmul.f32.gmra.mxu0 %v354_v18 }
  0xf9   : > { %661 = vmatmul.f32.gmra.mxu1 %v355_v19  ;;  %v369_v19 = vld [vmem:[%s1945_s28 + $0x238] sm:$0xff] }
  0xfa   : > { %v567_v22 = vpop.f32.mrf.mxu2  ;;  %1135 = vmatpush.msrb.mxu1 %v977_v24 }
  0xfb   : > { %v680_v23 = vpop.f32.mrf.mxu3 }
  0xfc   : > { %v2027_v26 = vadd.f32 %v680_v23, %v567_v22  ;;  %v345_v22 = vld [vmem:[%s1945_s28 + $0x178] sm:$0xff]  ;;  %v993_v23 = vld [vmem:[#allocation8 + $0x8] sm:$0xff]  ;;  %1136 = vmatpush.msrb.mxu1 %v976_v34 }
  0xfd   : > { %1022 = vmatpush.msrb.mxu0 %v993_v23 }
  0xff   : > { %747 = vmatmul.f32.gmra.mxu2 %v320_v27  ;;  %1023 = vmatpush.msrb.mxu0 %v992_v33  ;;  %v949_v33 = vld [vmem:[%s2080_s29 + $0x28] sm:$0xff] }
 0x100   : > { %860 = vmatmul.f32.gmra.mxu3 %v321_v28  ;;  %v358_v28 = vld [vmem:[%s1945_s28 + $0x1e0] sm:$0xff] }
 0x101   : > { %551 = vmatmul.f32.gmra.mxu0 %v358_v28  ;;  %664 = vmatmul.f32.gmra.mxu1 %v359_v29  ;;  %v372_v29 = vld [vmem:[%s1945_s28 + $0x250] sm:$0xff] }
 0x102   : > { %v570_v31 = vpop.f32.mrf.mxu2 }
 0x103   : > { %v683_v32 = vpop.f32.mrf.mxu3 }
 0x104   : > { %v2033_v35 = vadd.f32 %v683_v32, %v570_v31  ;;  %v348_v31 = vld [vmem:[%s1945_s28 + $0x190] sm:$0xff]  ;;  %v349_v32 = vld [vmem:[%s1945_s28 + $0x198] sm:$0xff] }
 0x107   : > { %750 = vmatmul.f32.gmra.mxu2 %v324_v36  ;;  %v507_v36 = vpop.f32.mrf.mxu0 }
 0x108   : > { %863 = vmatmul.f32.gmra.mxu3 %v325_v37  ;;  %v620_v37 = vpop.f32.mrf.mxu1 }
 0x109   : > { %1137 = vmatmul.f32.vlgmr.msrb.gmra.mxu1 %v944_v43 }
 0x10a   : > { %v573_v40 = vpop.f32.mrf.mxu2 }
 0x10b   : > { %v686_v41 = vpop.f32.mrf.mxu3 }
 0x10c   : > { %v2039_v44 = vadd.f32 %v686_v41, %v573_v40  ;;  %v352_v41 = vld [vmem:[%s1945_s28 + $0x1b0] sm:$0xff] }
 0x10f   : > { %753 = vmatmul.f32.gmra.mxu2 %v328_v45  ;;  %v510_v45 = vpop.f32.mrf.mxu0 }
 0x110   : > { %866 = vmatmul.f32.gmra.mxu3 %v329_v46  ;;  %v623_v46 = vpop.f32.mrf.mxu1 }
 0x111   : > { %1140 = vmatmul.f32.gmra.mxu1 %v945_v52  ;;  %v624_v23 = vadd.f32 %v623_v46, %v510_v45  ;;  %v377_v45 = vld [vmem:[%s1945_s28 + $0x278] sm:$0xff]  ;;  %v950_v46 = vld [vmem:[%s2080_s29 + $0x30] sm:$0xff] }
 0x112   : > { %v576_v49 = vpop.f32.mrf.mxu2 }
 0x113   : > { %v689_v50 = vpop.f32.mrf.mxu3 }
 0x114   : > { %v2045_v53 = vadd.f32 %v689_v50, %v576_v49  ;;  %v356_v50 = vld [vmem:[%s1945_s28 + $0x1d0] sm:$0xff] }
 0x117   : > { %756 = vmatmul.f32.gmra.mxu2 %v332_v55 }
 0x118   : > { %869 = vmatmul.f32.gmra.mxu3 %v333_v56  ;;  %v626_v55 = vpop.f32.mrf.mxu1  ;;  %v513_v56 = vpop.f32.mrf.mxu0 }
 0x119   : > { %1143 = vmatmul.f32.gmra.mxu1 %v946_v62  ;;  %v627_v34 = vadd.f32 %v626_v55, %v513_v56  ;;  %v380_v56 = vld [vmem:[%s1945_s28 + $0x290] sm:$0xff] }
 0x11a   : > { %v579_v59 = vpop.f32.mrf.mxu2 }
 0x11b   : > { %v692_v60 = vpop.f32.mrf.mxu3 }
 0x11c   : > { %v2051_v0 = vadd.f32 %v692_v60, %v579_v59  ;;  %v360_v60 = vld [vmem:[%s1945_s28 + $0x1f0] sm:$0xff] }
 0x11f   : > { %759 = vmatmul.f32.gmra.mxu2 %v336_v1 }
 0x120   : > { %872 = vmatmul.f32.gmra.mxu3 %v337_v2  ;;  %v629_v1 = vpop.f32.mrf.mxu1 }
 0x121   : > { %1146 = vmatmul.f32.gmra.mxu1 %v947_v9  ;;  %v385_v9 = vld [vmem:[%s1945_s28 + $0x2b8] sm:$0xff] }
 0x122   : > { %v582_v5 = vpop.f32.mrf.mxu2 }
 0x123   : > { %v695_v6 = vpop.f32.mrf.mxu3 }
 0x124   : > { %v2057_v10 = vadd.f32 %v695_v6, %v582_v5  ;;  %v516_v5 = vpop.f32.mrf.mxu0  ;;  %v364_v6 = vld [vmem:[%s1945_s28 + $0x210] sm:$0xff] }
 0x127   : > { %762 = vmatmul.f32.gmra.mxu2 %v340_v11  ;;  %v621_v11 = vadd.f32 %v620_v37, %v507_v36 }
 0x128   : > { %875 = vmatmul.f32.gmra.mxu3 %v341_v12  ;;  %v632_v12 = vpop.f32.mrf.mxu1 }
 0x12a   : > { %v585_v15 = vpop.f32.mrf.mxu2 }
 0x12b   : > { %v698_v16 = vpop.f32.mrf.mxu3 }
 0x12c   : > { %v2063_v20 = vadd.f32 %v698_v16, %v585_v15  ;;  %v368_v16 = vld [vmem:[%s1945_s28 + $0x230] sm:$0xff] }
 0x12f   : > { %765 = vmatmul.f32.gmra.mxu2 %v344_v21  ;;  %v519_v21 = vpop.f32.mrf.mxu0 }
 0x130   : > { %878 = vmatmul.f32.gmra.mxu3 %v345_v22  ;;  %v948_v22 = vld [vmem:[%s2080_s29 + $0x20] sm:$0xff]  ;;  %v635_v24 = vpop.f32.mrf.mxu1 }
 0x131   : > { %1149 = vmatmul.f32.gmra.mxu1 %v948_v22 }
 0x132   : > { %v588_v25 = vpop.f32.mrf.mxu2 }
 0x133   : > { %v701_v27 = vpop.f32.mrf.mxu3 }
 0x134   : > { %v2069_v30 = vadd.f32 %v701_v27, %v588_v25 }
 0x137   : > { %768 = vmatmul.f32.gmra.mxu2 %v348_v31  ;;  %v522_v36 = vpop.f32.mrf.mxu0 }
 0x138   : > { %881 = vmatmul.f32.gmra.mxu3 %v349_v32  ;;  %v373_v32 = vld [vmem:[%s1945_s28 + $0x258] sm:$0xff]  ;;  %v638_v37 = vpop.f32.mrf.mxu1 }
 0x139   : > { %1152 = vmatmul.f32.gmra.mxu1 %v949_v33  ;;  %v393_v33 = vld [vmem:[%s1945_s28 + $0x2f8] sm:$0xff] }
 0x13a   : > { %v591_v38 = vpop.f32.mrf.mxu2 }
 0x13b   : > { %v704_v39 = vpop.f32.mrf.mxu3 }
 0x13c   : > { %v2074_v40 = vadd.f32 %v704_v39, %v591_v38 }
 0x13f   : > { %771 = vmatmul.f32.gmra.mxu2 %v352_v41 }
 0x140   : > { %884 = vmatmul.f32.gmra.mxu3 %v353_v42  ;;  %v376_v42 = vld [vmem:[%s1945_s28 + $0x270] sm:$0xff] }
 0x141   : > { %1155 = vmatmul.f32.gmra.mxu1 %v950_v46  ;;  %v397_v46 = vld [vmem:[%s1945_s28 + $0x318] sm:$0xff] }
 0x142   : > { %v594_v47 = vpop.f32.mrf.mxu2 }
 0x143   : > { %v707_v48 = vpop.f32.mrf.mxu3 }
 0x144   : > { %v2083_v49 = vadd.f32 %v707_v48, %v594_v47  ;;  %v630_v47 = vadd.f32 %v629_v1, %v516_v5  ;;  %v641_v48 = vpop.f32.mrf.mxu1 }
 0x147   : > { %774 = vmatmul.f32.gmra.mxu2 %v356_v50  ;;  %v525_v50 = vpop.f32.mrf.mxu0 }
 0x148   : > { %887 = vmatmul.f32.gmra.mxu3 %v357_v51 }
 0x14a   : > { %v597_v57 = vpop.f32.mrf.mxu2 }
 0x14b   : > { %v710_v58 = vpop.f32.mrf.mxu3 }
 0x14c   : > { %v2088_v59 = vadd.f32 %v710_v58, %v597_v57  ;;  %v381_v58 = vld [vmem:[%s1945_s28 + $0x298] sm:$0xff]  ;;  %v644_v62 = vpop.f32.mrf.mxu1 }
 0x14f   : > { %777 = vmatmul.f32.gmra.mxu2 %v360_v60  ;;  %v951_v60 = vld [vmem:[%s2080_s29 + $0x38] sm:$0xff]  ;;  %v528_v5 = vpop.f32.mrf.mxu0 }
 0x150   : > { %890 = vmatmul.f32.gmra.mxu3 %v361_v61  ;;  %v633_v61 = vadd.f32 %v632_v12, %v519_v21  ;;  %1158 = vmatmul.f32.gmra.mxu1 %v951_v60  ;;  %v389_v21 = vld [vmem:[%s1945_s28 + $0x2d8] sm:$0xff] }
 0x151   : > { %v401_v60 = vld [vmem:[%s1945_s28 + $0x338] sm:$0xff] }
 0x152   : > { %v600_v2 = vpop.f32.mrf.mxu2 }
 0x153   : > { %v713_v3 = vpop.f32.mrf.mxu3 }
 0x154   : > { %v2093_v4 = vadd.f32 %v713_v3, %v600_v2  ;;  %v647_v12 = vpop.f32.mrf.mxu1 }
 0x157   : > { %780 = vmatmul.f32.gmra.mxu2 %v364_v6  ;;  %v384_v6 = vld [vmem:[%s1945_s28 + $0x2b0] sm:$0xff]  ;;  %v531_v22 = vpop.f32.mrf.mxu0 }
 0x158   : > { %893 = vmatmul.f32.gmra.mxu3 %v365_v7 }
 0x15a   : > { %v733_v13 = vpop.f32.mrf.mxu2 }
 0x15b   : > { %v846_v14 = vpop.f32.mrf.mxu3  ;;  %v734_v15 = vadd.f32 %v733_v13, %v621_v11  ;;  %v952_v11 = vld [vmem:[%s2080_s29 + $0x40] sm:$0xff]  ;;  %v636_v13 = vadd.f32 %v635_v24, %v522_v36  ;;  %v642_v36 = vadd.f32 %v641_v48, %v528_v5 }
 0x15c   : > { %1161 = vmatmul.f32.gmra.mxu1 %v952_v11  ;;  %v650_v24 = vpop.f32.mrf.mxu1  ;;  %v405_v11 = vld [vmem:[%s1945_s28 + $0x358] sm:$0xff] }
 0x15d   : > { %v847_v18 = vadd.f32 %v846_v14, %v734_v15 }
 0x15f   : > { %783 = vmatmul.f32.gmra.mxu2 %v368_v16  ;;  %1024 = vmatmul.f32.vlgmr.msrb.gmra.mxu0 %v847_v18  ;;  %v388_v18 = vld [vmem:[%s1945_s28 + $0x2d0] sm:$0xff] }
 0x160   : > { %896 = vmatmul.f32.gmra.mxu3 %v369_v19 }
 0x162   : > { %v736_v25 = vpop.f32.mrf.mxu2 }
 0x163   : > { %v849_v27 = vpop.f32.mrf.mxu3  ;;  %v737_v28 = vadd.f32 %v736_v25, %v624_v23  ;;  %v953_v23 = vld [vmem:[%s2080_s29 + $0x48] sm:$0xff]  ;;  %v639_v25 = vadd.f32 %v638_v37, %v525_v50  ;;  %v645_v50 = vadd.f32 %v644_v62, %v531_v22  ;;  %v409_v22 = vld [vmem:[%s1945_s28 + $0x378] sm:$0xff] }
 0x164   : > { %1164 = vmatmul.f32.gmra.mxu1 %v953_v23  ;;  %v653_v37 = vpop.f32.mrf.mxu1 }
 0x165   : > { %v850_v31 = vadd.f32 %v849_v27, %v737_v28 }
 0x167   : > { %786 = vmatmul.f32.gmra.mxu2 %v372_v29  ;;  %1027 = vmatmul.f32.gmra.mxu0 %v850_v31  ;;  %v392_v31 = vld [vmem:[%s1945_s28 + $0x2f0] sm:$0xff] }
 0x168   : > { %899 = vmatmul.f32.gmra.mxu3 %v373_v32 }
 0x16a   : > { %v739_v38 = vpop.f32.mrf.mxu2 }
 0x16b   : > { %v852_v39 = vpop.f32.mrf.mxu3  ;;  %v740_v41 = vadd.f32 %v739_v38, %v627_v34  ;;  %v954_v34 = vld [vmem:[%s2080_s29 + $0x50] sm:$0xff]  ;;  %v534_v38 = vpop.f32.mrf.mxu0 }
 0x16c   : > { %1167 = vmatmul.f32.gmra.mxu1 %v954_v34  ;;  %v656_v48 = vpop.f32.mrf.mxu1 }
 0x16d   : > { %v853_v43 = vadd.f32 %v852_v39, %v740_v41 }
 0x16f   : > { %789 = vmatmul.f32.gmra.mxu2 %v376_v42  ;;  %1030 = vmatmul.f32.gmra.mxu0 %v853_v43  ;;  %v396_v43 = vld [vmem:[%s1945_s28 + $0x310] sm:$0xff] }
 0x170   : > { %902 = vmatmul.f32.gmra.mxu3 %v377_v45 }
 0x172   : > { %v742_v51 = vpop.f32.mrf.mxu2 }
 0x173   : > { %v855_v52 = vpop.f32.mrf.mxu3  ;;  %v743_v55 = vadd.f32 %v742_v51, %v630_v47  ;;  %v955_v47 = vld [vmem:[%s2080_s29 + $0x58] sm:$0xff]  ;;  %v537_v51 = vpop.f32.mrf.mxu0 }
 0x174   : > { %1170 = vmatmul.f32.gmra.mxu1 %v955_v47  ;;  %v659_v62 = vpop.f32.mrf.mxu1 }
 0x175   : > { %v856_v57 = vadd.f32 %v855_v52, %v743_v55 }
 0x177   : > { %792 = vmatmul.f32.gmra.mxu2 %v380_v56  ;;  %1033 = vmatmul.f32.gmra.mxu0 %v856_v57  ;;  %v400_v57 = vld [vmem:[%s1945_s28 + $0x330] sm:$0xff] }
 0x178   : > { %905 = vmatmul.f32.gmra.mxu3 %v381_v58 }
 0x17a   : > { %v745_v1 = vpop.f32.mrf.mxu2 }
 0x17b   : > { %v858_v2 = vpop.f32.mrf.mxu3  ;;  %v746_v3 = vadd.f32 %v745_v1, %v633_v61  ;;  %v956_v61 = vld [vmem:[%s2080_s29 + $0x60] sm:$0xff]  ;;  %v648_v1 = vadd.f32 %v647_v12, %v534_v38 }
 0x17c   : > { %1173 = vmatmul.f32.gmra.mxu1 %v956_v61 }
 0x17d   : > { %v859_v7 = vadd.f32 %v858_v2, %v746_v3 }
 0x17f   : > { %795 = vmatmul.f32.gmra.mxu2 %v384_v6  ;;  %1036 = vmatmul.f32.gmra.mxu0 %v859_v7  ;;  %v540_v6 = vpop.f32.mrf.mxu0  ;;  %v404_v7 = vld [vmem:[%s1945_s28 + $0x350] sm:$0xff] }
 0x180   : > { %908 = vmatmul.f32.gmra.mxu3 %v385_v9 }
 0x182   : > { %v748_v14 = vpop.f32.mrf.mxu2 }
 0x183   : > { %v861_v15 = vpop.f32.mrf.mxu3  ;;  %v749_v16 = vadd.f32 %v748_v14, %v636_v13  ;;  %v957_v13 = vld [vmem:[%s2080_s29 + $0x68] sm:$0xff]  ;;  %v651_v14 = vadd.f32 %v650_v24, %v537_v51 }
 0x184   : > { %1176 = vmatmul.f32.gmra.mxu1 %v957_v13 }
 0x185   : > { %v862_v19 = vadd.f32 %v861_v15, %v749_v16 }
 0x187   : > { %798 = vmatmul.f32.gmra.mxu2 %v388_v18  ;;  %1039 = vmatmul.f32.gmra.mxu0 %v862_v19  ;;  %v662_v18 = vpop.f32.mrf.mxu1  ;;  %v408_v19 = vld [vmem:[%s1945_s28 + $0x370] sm:$0xff]  ;;  %v543_v23 = vpop.f32.mrf.mxu0 }
 0x188   : > { %911 = vmatmul.f32.gmra.mxu3 %v389_v21  ;;  %v657_v38 = vadd.f32 %v656_v48, %v543_v23 }
 0x18a   : > { %v751_v27 = vpop.f32.mrf.mxu2 }
 0x18b   : > { %v864_v28 = vpop.f32.mrf.mxu3  ;;  %v752_v29 = vadd.f32 %v751_v27, %v639_v25  ;;  %v958_v25 = vld [vmem:[%s2080_s29 + $0x70] sm:$0xff]  ;;  %v654_v27 = vadd.f32 %v653_v37, %v540_v6 }
 0x18c   : > { %1179 = vmatmul.f32.gmra.mxu1 %v958_v25  ;;  %v424_v6 = vld [vmem:[%s1945_s28 + $0x3f0] sm:$0xff] }
 0x18d   : > { %v865_v32 = vadd.f32 %v864_v28, %v752_v29 }
 0x18f   : > { %801 = vmatmul.f32.gmra.mxu2 %v392_v31  ;;  %1042 = vmatmul.f32.gmra.mxu0 %v865_v32  ;;  %v412_v31 = vld [vmem:[%s1945_s28 + $0x390] sm:$0xff]  ;;  %v665_v34 = vpop.f32.mrf.mxu1 }
 0x190   : > { %914 = vmatmul.f32.gmra.mxu3 %v393_v33  ;;  %v413_v33 = vld [vmem:[%s1945_s28 + $0x398] sm:$0xff] }
 0x192   : > { %v754_v39 = vpop.f32.mrf.mxu2 }
 0x193   : > { %v867_v41 = vpop.f32.mrf.mxu3  ;;  %v755_v42 = vadd.f32 %v754_v39, %v642_v36  ;;  %v959_v36 = vld [vmem:[%s2080_s29 + $0x78] sm:$0xff]  ;;  %v546_v39 = vpop.f32.mrf.mxu0 }
 0x194   : > { %1182 = vmatmul.f32.gmra.mxu1 %v959_v36  ;;  %v660_v51 = vadd.f32 %v659_v62, %v546_v39 }
 0x195   : > { %v868_v45 = vadd.f32 %v867_v41, %v755_v42 }
 0x197   : > { %804 = vmatmul.f32.gmra.mxu2 %v396_v43  ;;  %1045 = vmatmul.f32.gmra.mxu0 %v868_v45  ;;  %v416_v43 = vld [vmem:[%s1945_s28 + $0x3b0] sm:$0xff]  ;;  %v1138_v47 = vpop.f32.mrf.mxu1 }
 0x198   : > { %917 = vmatmul.f32.gmra.mxu3 %v397_v46  ;;  %v417_v46 = vld [vmem:[%s1945_s28 + $0x3b8] sm:$0xff] }
 0x19a   : > { %v757_v52 = vpop.f32.mrf.mxu2 }
 0x19b   : > { %v870_v55 = vpop.f32.mrf.mxu3  ;;  %v758_v56 = vadd.f32 %v757_v52, %v645_v50  ;;  %v960_v50 = vld [vmem:[%s2080_s29 + $0x80] sm:$0xff]  ;;  %v549_v48 = vpop.f32.mrf.mxu0 }
 0x19c   : > { %1185 = vmatmul.f32.gmra.mxu1 %v960_v50 }
 0x19d   : > { %v871_v58 = vadd.f32 %v870_v55, %v758_v56 }
 0x19f   : > { %807 = vmatmul.f32.gmra.mxu2 %v400_v57  ;;  %1048 = vmatmul.f32.gmra.mxu0 %v871_v58  ;;  %v420_v57 = vld [vmem:[%s1945_s28 + $0x3d0] sm:$0xff]  ;;  %v1141_v61 = vpop.f32.mrf.mxu1 }
 0x1a0   : > { %920 = vmatmul.f32.gmra.mxu3 %v401_v60  ;;  %v421_v60 = vld [vmem:[%s1945_s28 + $0x3d8] sm:$0xff] }
 0x1a2   : > { %v760_v2 = vpop.f32.mrf.mxu2 }
 0x1a3   : > { %v873_v3 = vpop.f32.mrf.mxu3  ;;  %v761_v5 = vadd.f32 %v760_v2, %v648_v1  ;;  %v961_v1 = vld [vmem:[%s2080_s29 + $0x88] sm:$0xff]  ;;  %v663_v2 = vadd.f32 %v662_v18, %v549_v48 }
 0x1a4   : > { %1188 = vmatmul.f32.gmra.mxu1 %v961_v1 }
 0x1a5   : > { %v874_v9 = vadd.f32 %v873_v3, %v761_v5 }
 0x1a7   : > { %810 = vmatmul.f32.gmra.mxu2 %v404_v7  ;;  %1051 = vmatmul.f32.gmra.mxu0 %v874_v9  ;;  %v552_v7 = vpop.f32.mrf.mxu0  ;;  %v1144_v13 = vpop.f32.mrf.mxu1 }
 0x1a8   : > { %923 = vmatmul.f32.gmra.mxu3 %v405_v11  ;;  %v425_v11 = vld [vmem:[%s1945_s28 + $0x3f8] sm:$0xff] }
 0x1aa   : > { %v763_v12 = vpop.f32.mrf.mxu2 }
 0x1ab   : > { %v876_v15 = vpop.f32.mrf.mxu3  ;;  %v764_v16 = vadd.f32 %v763_v12, %v651_v14  ;;  %v962_v14 = vld [vmem:[%s2080_s29 + $0x90] sm:$0xff]  ;;  %v666_v12 = vadd.f32 %v665_v34, %v552_v7 }
 0x1ac   : > { %1191 = vmatmul.f32.gmra.mxu1 %v962_v14 }
 0x1ad   : > { %v877_v21 = vadd.f32 %v876_v15, %v764_v16 }
 0x1af   : > { %813 = vmatmul.f32.gmra.mxu2 %v408_v19  ;;  %1054 = vmatmul.f32.gmra.mxu0 %v877_v21  ;;  %v1147_v21 = vpop.f32.mrf.mxu1 }
 0x1b0   : > { %926 = vmatmul.f32.gmra.mxu3 %v409_v22  ;;  %v963_v22 = vld [vmem:[%s2080_s29 + $0x98] sm:$0xff] }
 0x1b2   : > { %v766_v24 = vpop.f32.mrf.mxu2 }
 0x1b3   : > { %v879_v28 = vpop.f32.mrf.mxu3  ;;  %v767_v29 = vadd.f32 %v766_v24, %v654_v27  ;;  %v2148_v24 = vld [vmem:[%s2283_s4] ss:$0 sm:$0xff] }
 0x1b4   : > { %1194 = vmatmul.f32.gmra.mxu1 %v963_v22 }
 0x1b5   : > { %v880_v32 = vadd.f32 %v879_v28, %v767_v29 }
 0x1b7   : > { %816 = vmatmul.f32.gmra.mxu2 %v412_v31  ;;  %1057 = vmatmul.f32.gmra.mxu0 %v880_v32  ;;  %v1150_v32 = vpop.f32.mrf.mxu1 }
 0x1b8   : > { %929 = vmatmul.f32.gmra.mxu3 %v413_v33  ;;  %v964_v33 = vld [vmem:[%s2080_s29 + $0xa0] sm:$0xff] }
 0x1ba   : > { %v769_v37 = vpop.f32.mrf.mxu2 }
 0x1bb   : > { %v882_v41 = vpop.f32.mrf.mxu3  ;;  %v770_v42 = vadd.f32 %v769_v37, %v657_v38 }
 0x1bc   : > { %1197 = vmatmul.f32.gmra.mxu1 %v964_v33 }
 0x1bd   : > { %v883_v45 = vadd.f32 %v882_v41, %v770_v42 }
 0x1bf   : > { %819 = vmatmul.f32.gmra.mxu2 %v416_v43  ;;  %1060 = vmatmul.f32.gmra.mxu0 %v883_v45  ;;  %v1153_v43 = vpop.f32.mrf.mxu1  ;;  %v965_v45 = vld [vmem:[%s2080_s29 + $0xa8] sm:$0xff] }
 0x1c0   : > { %932 = vmatmul.f32.gmra.mxu3 %v417_v46 }
 0x1c2   : > { %v772_v52 = vpop.f32.mrf.mxu2 }
 0x1c3   : > { %v885_v55 = vpop.f32.mrf.mxu3  ;;  %v773_v56 = vadd.f32 %v772_v52, %v660_v51 }
 0x1c4   : > { %1200 = vmatmul.f32.gmra.mxu1 %v965_v45 }
 0x1c5   : > { %v886_v58 = vadd.f32 %v885_v55, %v773_v56 }
 0x1c7   : > { %822 = vmatmul.f32.gmra.mxu2 %v420_v57  ;;  %1063 = vmatmul.f32.gmra.mxu0 %v886_v58  ;;  %v1156_v56 = vpop.f32.mrf.mxu1  ;;  %v966_v57 = vld [vmem:[%s2080_s29 + $0xb0] sm:$0xff] }
 0x1c8   : > { %935 = vmatmul.f32.gmra.mxu3 %v421_v60 }
 0x1ca   : > { %v775_v62 = vpop.f32.mrf.mxu2 }
 0x1cb   : > { %v888_v3 = vpop.f32.mrf.mxu3  ;;  %v776_v5 = vadd.f32 %v775_v62, %v663_v2 }
 0x1cc   : > { %1203 = vmatmul.f32.gmra.mxu1 %v966_v57 }
 0x1cd   : > { %v889_v9 = vadd.f32 %v888_v3, %v776_v5 }
 0x1cf   : > { %825 = vmatmul.f32.gmra.mxu2 %v424_v6  ;;  %1066 = vmatmul.f32.gmra.mxu0 %v889_v9  ;;  %v1159_v5 = vpop.f32.mrf.mxu1  ;;  %v967_v6 = vld [vmem:[%s2080_s29 + $0xb8] sm:$0xff] }
 0x1d0   : > { %938 = vmatmul.f32.gmra.mxu3 %v425_v11 }
 0x1d2   : > { %v778_v15 = vpop.f32.mrf.mxu2 }
 0x1d3   : > { %v891_v16 = vpop.f32.mrf.mxu3  ;;  %v779_v18 = vadd.f32 %v778_v15, %v666_v12 }
 0x1d4   : > { %1206 = vmatmul.f32.gmra.mxu1 %v967_v6 }
 0x1d5   : > { %v892_v19 = vadd.f32 %v891_v16, %v779_v18  ;;  %v968_v18 = vld [vmem:[%s2080_s29 + $0xc0] sm:$0xff] }
 0x1d7   : > { %1069 = vmatmul.f32.gmra.mxu0 %v892_v19 }
 0x1d9   : > { %v1162_v16 = vpop.f32.mrf.mxu1 }
 0x1da   : > { %v781_v23 = vpop.f32.mrf.mxu2 }
 0x1db   : > { %v894_v25 = vpop.f32.mrf.mxu3  ;;  %v782_v27 = vadd.f32 %v781_v23, %v2003_v54 }
 0x1dc   : > { %v1025_v28 = vpop.f32.mrf.mxu0  ;;  %1209 = vmatmul.f32.gmra.mxu1 %v968_v18 }
 0x1dd   : > { %v895_v29 = vadd.f32 %v894_v25, %v782_v27  ;;  %v1139_v31 = vadd.f32 %v1138_v47, %v1025_v28 }
 0x1df   : > { %v1238_v34 = vadd.f32 %v2148_v24, %v1139_v31  ;;  %1072 = vmatmul.f32.gmra.mxu0 %v895_v29  ;;  %v969_v31 = vld [vmem:[%s2080_s29 + $0xc8] sm:$0xff] }
 0x1e1   : > { %v1270_v36 = vmax.f32 %v1238_v34, 0.0  ;;  %v1165_v29 = vpop.f32.mrf.mxu1 }
 0x1e2   : > { %v784_v38 = vpop.f32.mrf.mxu2 }
 0x1e3   : > { %1302 = vst [vmem:[%s2153_s23] sm:$0xff] %v1270_v36  ;;  %v785_v54 = vadd.f32 %v784_v38, %v2009_v63  ;;  %v897_v39 = vpop.f32.mrf.mxu3 }
 0x1e4   : > { %v1028_v37 = vpop.f32.mrf.mxu0  ;;  %1212 = vmatmul.f32.gmra.mxu1 %v969_v31 }
 0x1e5   : > { %v898_v41 = vadd.f32 %v897_v39, %v785_v54  ;;  %v1142_v42 = vadd.f32 %v1141_v61, %v1028_v37 }
 0x1e7   : > { %v1239_v46 = vadd.f32 %v2148_v24, %v1142_v42  ;;  %1075 = vmatmul.f32.gmra.mxu0 %v898_v41  ;;  %v970_v41 = vld [vmem:[%s2080_s29 + $0xd0] sm:$0xff] }
 0x1e9   : > { %v1271_v47 = vmax.f32 %v1239_v46, 0.0  ;;  %v1168_v37 = vpop.f32.mrf.mxu1 }
 0x1ea   : > { %v787_v50 = vpop.f32.mrf.mxu2 }
 0x1eb   : > { %1303 = vst [vmem:[%s2153_s23 + $0x8] sm:$0xff] %v1271_v47  ;;  %v788_v51 = vadd.f32 %v787_v50, %v2015_v8  ;;  %v900_v48 = vpop.f32.mrf.mxu3 }
 0x1ec   : > { %v1031_v52 = vpop.f32.mrf.mxu0  ;;  %1215 = vmatmul.f32.gmra.mxu1 %v970_v41 }
 0x1ed   : > { %v901_v63 = vadd.f32 %v900_v48, %v788_v51  ;;  %v1145_v55 = vadd.f32 %v1144_v13, %v1031_v52  ;;  %v971_v52 = vld [vmem:[%s2080_s29 + $0xd8] sm:$0xff] }
 0x1ef   : > { %v1240_v58 = vadd.f32 %v2148_v24, %v1145_v55  ;;  %1078 = vmatmul.f32.gmra.mxu0 %v901_v63 }
 0x1f1   : > { %v1272_v60 = vmax.f32 %v1240_v58, 0.0  ;;  %v1171_v48 = vpop.f32.mrf.mxu1 }
 0x1f2   : > { %v790_v61 = vpop.f32.mrf.mxu2 }
 0x1f3   : > { %1304 = vst [vmem:[%s2153_s23 + $0x10] sm:$0xff] %v1272_v60  ;;  %v791_v1 = vadd.f32 %v790_v61, %v2021_v17  ;;  %v903_v2 = vpop.f32.mrf.mxu3 }
 0x1f4   : > { %v1034_v62 = vpop.f32.mrf.mxu0  ;;  %1218 = vmatmul.f32.gmra.mxu1 %v971_v52 }
 0x1f5   : > { %v904_v8 = vadd.f32 %v903_v2, %v791_v1  ;;  %v1148_v3 = vadd.f32 %v1147_v21, %v1034_v62  ;;  %v972_v2 = vld [vmem:[%s2080_s29 + $0xe0] sm:$0xff] }
 0x1f7   : > { %v1241_v7 = vadd.f32 %v2148_v24, %v1148_v3  ;;  %1081 = vmatmul.f32.gmra.mxu0 %v904_v8 }
 0x1f9   : > { %v1273_v9 = vmax.f32 %v1241_v7, 0.0  ;;  %v1174_v1 = vpop.f32.mrf.mxu1 }
 0x1fa   : > { %v793_v11 = vpop.f32.mrf.mxu2 }
 0x1fb   : > { %1305 = vst [vmem:[%s2153_s23 + $0x18] sm:$0xff] %v1273_v9  ;;  %v794_v13 = vadd.f32 %v793_v11, %v2027_v26  ;;  %v906_v14 = vpop.f32.mrf.mxu3 }
 0x1fc   : > { %v1037_v12 = vpop.f32.mrf.mxu0  ;;  %1221 = vmatmul.f32.gmra.mxu1 %v972_v2 }
 0x1fd   : > { %v907_v17 = vadd.f32 %v906_v14, %v794_v13  ;;  %v1151_v15 = vadd.f32 %v1150_v32, %v1037_v12  ;;  %v973_v13 = vld [vmem:[%s2080_s29 + $0xe8] sm:$0xff] }
 0x1ff   : > { %v1242_v19 = vadd.f32 %v2148_v24, %v1151_v15  ;;  %1084 = vmatmul.f32.gmra.mxu0 %v907_v17 }
 0x201   : > { %v1274_v21 = vmax.f32 %v1242_v19, 0.0  ;;  %v1177_v11 = vpop.f32.mrf.mxu1 }
 0x202   : > { %v796_v22 = vpop.f32.mrf.mxu2 }
 0x203   : > { %1306 = vst [vmem:[%s2153_s23 + $0x20] sm:$0xff] %v1274_v21  ;;  %v797_v23 = vadd.f32 %v796_v22, %v2033_v35  ;;  %v909_v25 = vpop.f32.mrf.mxu3  ;;  %v974_v22 = vld [vmem:[%s2080_s29 + $0xf0] sm:$0xff] }
 0x204   : > { %v1040_v27 = vpop.f32.mrf.mxu0  ;;  %1224 = vmatmul.f32.gmra.mxu1 %v973_v13 }
 0x205   : > { %v910_v26 = vadd.f32 %v909_v25, %v797_v23  ;;  %v1154_v28 = vadd.f32 %v1153_v43, %v1040_v27 }
 0x207   : > { %v1243_v32 = vadd.f32 %v2148_v24, %v1154_v28  ;;  %1087 = vmatmul.f32.gmra.mxu0 %v910_v26 }
 0x209   : > { %v1275_v33 = vmax.f32 %v1243_v32, 0.0  ;;  %v1180_v21 = vpop.f32.mrf.mxu1 }
 0x20a   : > { %v799_v34 = vpop.f32.mrf.mxu2 }
 0x20b   : > { %1307 = vst [vmem:[%s2153_s23 + $0x28] sm:$0xff] %v1275_v33  ;;  %v800_v36 = vadd.f32 %v799_v34, %v2039_v44  ;;  %v912_v38 = vpop.f32.mrf.mxu3  ;;  %v975_v33 = vld [vmem:[%s2080_s29 + $0xf8] sm:$0xff] }
 0x20c   : > { %v1043_v54 = vpop.f32.mrf.mxu0  ;;  %1227 = vmatmul.f32.gmra.mxu1 %v974_v22 }
 0x20d   : > { %v913_v35 = vadd.f32 %v912_v38, %v800_v36  ;;  %v1157_v39 = vadd.f32 %v1156_v56, %v1043_v54 }
 0x20f   : > { %v1244_v42 = vadd.f32 %v2148_v24, %v1157_v39  ;;  %1090 = vmatmul.f32.gmra.mxu0 %v913_v35 }
 0x211   : > { %v1276_v43 = vmax.f32 %v1244_v42, 0.0  ;;  %v1183_v32 = vpop.f32.mrf.mxu1 }
 0x212   : > { %v802_v45 = vpop.f32.mrf.mxu2 }
 0x213   : > { %1308 = vst [vmem:[%s2153_s23 + $0x30] sm:$0xff] %v1276_v43  ;;  %v803_v46 = vadd.f32 %v802_v45, %v2045_v53  ;;  %v915_v47 = vpop.f32.mrf.mxu3 }
 0x214   : > { %v1046_v50 = vpop.f32.mrf.mxu0  ;;  %1230 = vmatmul.f32.gmra.mxu1 %v975_v33 }
 0x215   : > { %v916_v44 = vadd.f32 %v915_v47, %v803_v46  ;;  %v1160_v51 = vadd.f32 %v1159_v5, %v1046_v50 }
 0x217   : > { %v1245_v63 = vadd.f32 %v2148_v24, %v1160_v51  ;;  %1093 = vmatmul.f32.gmra.mxu0 %v916_v44 }
 0x219   : > { %v1277_v55 = vmax.f32 %v1245_v63, 0.0  ;;  %v1186_v41 = vpop.f32.mrf.mxu1 }
 0x21a   : > { %v805_v56 = vpop.f32.mrf.mxu2 }
 0x21b   : > { %1309 = vst [vmem:[%s2153_s23 + $0x38] sm:$0xff] %v1277_v55  ;;  %v806_v57 = vadd.f32 %v805_v56, %v2051_v0  ;;  %v918_v58 = vpop.f32.mrf.mxu3 }
 0x21c   : > { %v1049_v60 = vpop.f32.mrf.mxu0 }
 0x21d   : > { %v919_v53 = vadd.f32 %v918_v58, %v806_v57  ;;  %v1163_v61 = vadd.f32 %v1162_v16, %v1049_v60 }
 0x21f   : > { %v1246_v62 = vadd.f32 %v2148_v24, %v1163_v61  ;;  %1096 = vmatmul.f32.gmra.mxu0 %v919_v53 }
 0x221   : > { %v1278_v8 = vmax.f32 %v1246_v62, 0.0 }
 0x222   : > { %v808_v3 = vpop.f32.mrf.mxu2 }
 0x223   : > { %1310 = vst [vmem:[%s2153_s23 + $0x40] sm:$0xff] %v1278_v8  ;;  %v809_v5 = vadd.f32 %v808_v3, %v2057_v10  ;;  %v921_v6 = vpop.f32.mrf.mxu3 }
 0x224   : > { %v1052_v7 = vpop.f32.mrf.mxu0 }
 0x225   : > { %v922_v0 = vadd.f32 %v921_v6, %v809_v5  ;;  %v1166_v9 = vadd.f32 %v1165_v29, %v1052_v7 }
 0x227   : > { %v1247_v14 = vadd.f32 %v2148_v24, %v1166_v9  ;;  %1099 = vmatmul.f32.gmra.mxu0 %v922_v0 }
 0x229   : > { %v1279_v12 = vmax.f32 %v1247_v14, 0.0 }
 0x22a   : > { %v811_v17 = vpop.f32.mrf.mxu2 }
 0x22b   : > { %1311 = vst [vmem:[%s2153_s23 + $0x48] sm:$0xff] %v1279_v12  ;;  %v812_v15 = vadd.f32 %v811_v17, %v2063_v20  ;;  %v924_v16 = vpop.f32.mrf.mxu3 }
 0x22c   : > { %v1055_v18 = vpop.f32.mrf.mxu0 }
 0x22d   : > { %v925_v10 = vadd.f32 %v924_v16, %v812_v15  ;;  %v1169_v19 = vadd.f32 %v1168_v37, %v1055_v18 }
 0x22f   : > { %v1248_v23 = vadd.f32 %v2148_v24, %v1169_v19  ;;  %1102 = vmatmul.f32.gmra.mxu0 %v925_v10 }
 0x231   : > { %v1280_v25 = vmax.f32 %v1248_v23, 0.0 }
 0x232   : > { %v814_v27 = vpop.f32.mrf.mxu2 }
 0x233   : > { %1312 = vst [vmem:[%s2153_s23 + $0x50] sm:$0xff] %v1280_v25  ;;  %v815_v26 = vadd.f32 %v814_v27, %v2069_v30  ;;  %v927_v28 = vpop.f32.mrf.mxu3 }
 0x234   : > { %v1058_v29 = vpop.f32.mrf.mxu0 }
 0x235   : > { %v928_v20 = vadd.f32 %v927_v28, %v815_v26  ;;  %v1172_v31 = vadd.f32 %v1171_v48, %v1058_v29  ;;  %v1189_v48 = vpop.f32.mrf.mxu1 }
 0x237   : > { %v1249_v34 = vadd.f32 %v2148_v24, %v1172_v31  ;;  %1105 = vmatmul.f32.gmra.mxu0 %v928_v20 }
 0x239   : > { %v1281_v36 = vmax.f32 %v1249_v34, 0.0 }
 0x23a   : > { %v817_v38 = vpop.f32.mrf.mxu2 }
 0x23b   : > { %1313 = vst [vmem:[%s2153_s23 + $0x58] sm:$0xff] %v1281_v36  ;;  %v818_v54 = vadd.f32 %v817_v38, %v2074_v40  ;;  %v930_v35 = vpop.f32.mrf.mxu3 }
 0x23c   : > { %v1061_v39 = vpop.f32.mrf.mxu0 }
 0x23d   : > { %v931_v37 = vadd.f32 %v930_v35, %v818_v54  ;;  %v1175_v30 = vadd.f32 %v1174_v1, %v1061_v39  ;;  %v1192_v53 = vpop.f32.mrf.mxu1 }
 0x23f   : > { %v1250_v42 = vadd.f32 %v2148_v24, %v1175_v30  ;;  %1108 = vmatmul.f32.gmra.mxu0 %v931_v37 }
 0x241   : > { %v1282_v43 = vmax.f32 %v1250_v42, 0.0 }
 0x242   : > { %v820_v45 = vpop.f32.mrf.mxu2 }
 0x243   : > { %1314 = vst [vmem:[%s2153_s23 + $0x60] sm:$0xff] %v1282_v43  ;;  %v821_v46 = vadd.f32 %v820_v45, %v2083_v49  ;;  %v933_v47 = vpop.f32.mrf.mxu3 }
 0x244   : > { %v1064_v50 = vpop.f32.mrf.mxu0 }
 0x245   : > { %v934_v44 = vadd.f32 %v933_v47, %v821_v46  ;;  %v1178_v51 = vadd.f32 %v1177_v11, %v1064_v50  ;;  %v1195_v7 = vpop.f32.mrf.mxu1 }
 0x247   : > { %v1251_v40 = vadd.f32 %v2148_v24, %v1178_v51  ;;  %1111 = vmatmul.f32.gmra.mxu0 %v934_v44 }
 0x249   : > { %v1283_v52 = vmax.f32 %v1251_v40, 0.0 }
 0x24a   : > { %v823_v63 = vpop.f32.mrf.mxu2 }
 0x24b   : > { %1315 = vst [vmem:[%s2153_s23 + $0x68] sm:$0xff] %v1283_v52  ;;  %v824_v55 = vadd.f32 %v823_v63, %v2088_v59  ;;  %v936_v56 = vpop.f32.mrf.mxu3 }
 0x24c   : > { %v1067_v57 = vpop.f32.mrf.mxu0 }
 0x24d   : > { %v937_v58 = vadd.f32 %v936_v56, %v824_v55  ;;  %v1181_v60 = vadd.f32 %v1180_v21, %v1067_v57 }
 0x24f   : > { %v1252_v49 = vadd.f32 %v2148_v24, %v1181_v60  ;;  %1114 = vmatmul.f32.gmra.mxu0 %v937_v58 }
 0x251   : > { %v1284_v61 = vmax.f32 %v1252_v49, 0.0 }
 0x252   : > { %v826_v1 = vpop.f32.mrf.mxu2 }
 0x253   : > { %1316 = vst [vmem:[%s2153_s23 + $0x70] sm:$0xff] %v1284_v61  ;;  %v827_v2 = vadd.f32 %v826_v1, %v2093_v4  ;;  %v939_v62 = vpop.f32.mrf.mxu3  ;;  %v1198_v4 = vpop.f32.mrf.mxu1 }
 0x254   : > { %v1070_v8 = vpop.f32.mrf.mxu0 }
 0x255   : > { %v940_v3 = vadd.f32 %v939_v62, %v827_v2  ;;  %v1184_v5 = vadd.f32 %v1183_v32, %v1070_v8 }
 0x257   : > { %v1253_v59 = vadd.f32 %v2148_v24, %v1184_v5  ;;  %1117 = vmatmul.f32.gmra.mxu0 %v940_v3 }
 0x259   : > { %v1285_v6 = vmax.f32 %v1253_v59, 0.0 }
 0x25b   : > { %1317 = vst [vmem:[%s2153_s23 + $0x78] sm:$0xff] %v1285_v6  ;;  %v1201_v10 = vpop.f32.mrf.mxu1 }
 0x25c   : > { %v1073_v0 = vpop.f32.mrf.mxu0 }
 0x25d   : > { %v1187_v9 = vadd.f32 %v1186_v41, %v1073_v0 }
 0x25f   : > { %v1254_v11 = vadd.f32 %v2148_v24, %v1187_v9 }
 0x261   : > { %v1286_v13 = vmax.f32 %v1254_v11, 0.0 }
 0x263   : > { %1318 = vst [vmem:[%s2153_s23 + $0x80] sm:$0xff] %v1286_v13  ;;  %v1204_v27 = vpop.f32.mrf.mxu1 }
 0x264   : > { %v1076_v14 = vpop.f32.mrf.mxu0 }
 0x265   : > { %v1190_v12 = vadd.f32 %v1189_v48, %v1076_v14 }
 0x267   : > { %v1255_v17 = vadd.f32 %v2148_v24, %v1190_v12 }
 0x269   : > { %v1287_v15 = vmax.f32 %v1255_v17, 0.0 }
 0x26b   : > { %1319 = vst [vmem:[%s2153_s23 + $0x88] sm:$0xff] %v1287_v15  ;;  %v1207_v32 = vpop.f32.mrf.mxu1 }
 0x26c   : > { %v1079_v16 = vpop.f32.mrf.mxu0 }
 0x26d   : > { %v1193_v18 = vadd.f32 %v1192_v53, %v1079_v16 }
 0x26f   : > { %v1256_v19 = vadd.f32 %v2148_v24, %v1193_v18 }
 0x271   : > { %v1288_v21 = vmax.f32 %v1256_v19, 0.0 }
 0x273   : > { %1320 = vst [vmem:[%s2153_s23 + $0x90] sm:$0xff] %v1288_v21  ;;  %v1210_v35 = vpop.f32.mrf.mxu1 }
 0x274   : > { %v1082_v22 = vpop.f32.mrf.mxu0 }
 0x275   : > { %v1196_v23 = vadd.f32 %v1195_v7, %v1082_v22 }
 0x277   : > { %v1257_v25 = vadd.f32 %v2148_v24, %v1196_v23 }
 0x279   : > { %v1289_v26 = vmax.f32 %v1257_v25, 0.0 }
 0x27b   : > { %1321 = vst [vmem:[%s2153_s23 + $0x98] sm:$0xff] %v1289_v26  ;;  %v1213_v43 = vpop.f32.mrf.mxu1 }
 0x27c   : > { %v1085_v28 = vpop.f32.mrf.mxu0 }
 0x27d   : > { %v1199_v29 = vadd.f32 %v1198_v4, %v1085_v28 }
 0x27f   : > { %v1258_v20 = vadd.f32 %v2148_v24, %v1199_v29 }
 0x281   : > { %v1290_v31 = vmax.f32 %v1258_v20, 0.0 }
 0x283   : > { %1322 = vst [vmem:[%s2153_s23 + $0xa0] sm:$0xff] %v1290_v31  ;;  %v1216_v51 = vpop.f32.mrf.mxu1 }
 0x284   : > { %v1088_v33 = vpop.f32.mrf.mxu0 }
 0x285   : > { %v1202_v34 = vadd.f32 %v1201_v10, %v1088_v33 }
 0x287   : > { %v1259_v36 = vadd.f32 %v2148_v24, %v1202_v34 }
 0x289   : > { %v1291_v38 = vmax.f32 %v1259_v36, 0.0 }
 0x28b   : > { %1323 = vst [vmem:[%s2153_s23 + $0xa8] sm:$0xff] %v1291_v38  ;;  %v1219_v56 = vpop.f32.mrf.mxu1 }
 0x28c   : > { %v1091_v54 = vpop.f32.mrf.mxu0 }
 0x28d   : > { %v1205_v39 = vadd.f32 %v1204_v27, %v1091_v54 }
 0x28f   : > { %v1260_v37 = vadd.f32 %v2148_v24, %v1205_v39 }
 0x291   : > { %v1292_v30 = vmax.f32 %v1260_v37, 0.0 }
 0x293   : > { %1324 = vst [vmem:[%s2153_s23 + $0xb0] sm:$0xff] %v1292_v30  ;;  %v1222_v61 = vpop.f32.mrf.mxu1 }
 0x294   : > { %v1094_v41 = vpop.f32.mrf.mxu0 }
 0x295   : > { %v1208_v42 = vadd.f32 %v1207_v32, %v1094_v41 }
 0x297   : > { %v1261_v45 = vadd.f32 %v2148_v24, %v1208_v42 }
 0x299   : > { %v1293_v46 = vmax.f32 %v1261_v45, 0.0 }
 0x29b   : > { %1325 = vst [vmem:[%s2153_s23 + $0xb8] sm:$0xff] %v1293_v46  ;;  %v1225_v5 = vpop.f32.mrf.mxu1 }
 0x29c   : > { %v1097_v47 = vpop.f32.mrf.mxu0 }
 0x29d   : > { %v1211_v50 = vadd.f32 %v1210_v35, %v1097_v47 }
 0x29f   : > { %v1262_v44 = vadd.f32 %v2148_v24, %v1211_v50 }
 0x2a1   : > { %v1294_v48 = vmax.f32 %v1262_v44, 0.0 }
 0x2a3   : > { %1326 = vst [vmem:[%s2153_s23 + $0xc0] sm:$0xff] %v1294_v48  ;;  %v1228_v11 = vpop.f32.mrf.mxu1 }
 0x2a4   : > { %v1100_v40 = vpop.f32.mrf.mxu0 }
 0x2a5   : > { %v1214_v52 = vadd.f32 %v1213_v43, %v1100_v40 }
 0x2a7   : > { %v1263_v63 = vadd.f32 %v2148_v24, %v1214_v52 }
 0x2a9   : > { %v1295_v55 = vmax.f32 %v1263_v63, 0.0 }
 0x2ab   : > { %1327 = vst [vmem:[%s2153_s23 + $0xc8] sm:$0xff] %v1295_v55  ;;  %v1231_v15 = vpop.f32.mrf.mxu1 }
 0x2ac   : > { %v1103_v57 = vpop.f32.mrf.mxu0 }
 0x2ad   : > { %v1217_v58 = vadd.f32 %v1216_v51, %v1103_v57 }
 0x2af   : > { %v1264_v60 = vadd.f32 %v2148_v24, %v1217_v58 }
 0x2b1   : > { %v1296_v49 = vmax.f32 %v1264_v60, 0.0 }
 0x2b3   : > { %1328 = vst [vmem:[%s2153_s23 + $0xd0] sm:$0xff] %v1296_v49 }
 0x2b4   : > { %v1106_v53 = vpop.f32.mrf.mxu0 }
 0x2b5   : > { %v1220_v1 = vadd.f32 %v1219_v56, %v1106_v53 }
 0x2b7   : > { %v1265_v2 = vadd.f32 %v2148_v24, %v1220_v1 }
 0x2b9   : > { %v1297_v62 = vmax.f32 %v1265_v2, 0.0 }
 0x2bb   : > { %1329 = vst [vmem:[%s2153_s23 + $0xd8] sm:$0xff] %v1297_v62 }
 0x2bc   : > { %v1109_v8 = vpop.f32.mrf.mxu0 }
 0x2bd   : > { %v1223_v3 = vadd.f32 %v1222_v61, %v1109_v8 }
 0x2bf   : > { %v1266_v59 = vadd.f32 %v2148_v24, %v1223_v3 }
 0x2c1   : > { %v1298_v6 = vmax.f32 %v1266_v59, 0.0 }
 0x2c3   : > { %1330 = vst [vmem:[%s2153_s23 + $0xe0] sm:$0xff] %v1298_v6 }
 0x2c4   : > { %v1112_v7 = vpop.f32.mrf.mxu0 }
 0x2c5   : > { %v1226_v0 = vadd.f32 %v1225_v5, %v1112_v7 }
 0x2c7   : > { %v1267_v9 = vadd.f32 %v2148_v24, %v1226_v0 }
 0x2c9   : > { %v1299_v13 = vmax.f32 %v1267_v9, 0.0 }
 0x2cb   : > { %1331 = vst [vmem:[%s2153_s23 + $0xe8] sm:$0xff] %v1299_v13 }
 0x2cc   : > { %v1115_v14 = vpop.f32.mrf.mxu0 }
 0x2cd   : > { %v1229_v4 = vadd.f32 %v1228_v11, %v1115_v14 }
 0x2cf   : > { %v1268_v12 = vadd.f32 %v2148_v24, %v1229_v4 }
 0x2d1   : > { %v1300_v17 = vmax.f32 %v1268_v12, 0.0 }
 0x2d3   : > { %1332 = vst [vmem:[%s2153_s23 + $0xf0] sm:$0xff] %v1300_v17 }
 0x2d4   : > { %v1118_v16 = vpop.f32.mrf.mxu0 }
 0x2d5   : > { %v1232_v18 = vadd.f32 %v1231_v15, %v1118_v16 }
 0x2d7   : > { %v1269_v10 = vadd.f32 %v2148_v24, %v1232_v18 }
 0x2d9   : > { %v1301_v19 = vmax.f32 %v1269_v10, 0.0 }
 0x2db   : > { %1333 = vst [vmem:[%s2153_s23 + $0xf8] sm:$0xff] %v1301_v19 }
 0x2dc   : > { %1742 = shalt.err (!%p1739_p10)
}
 0x2dd   : > { %s1798_s15 = smov 128   ;;  %s1799_s16 = smov 8  }
 0x2de   : > { %1525 = dma.vmem_to_hbm [thread:$0]  (%p1913_p7), %s1348_s9, 4096, %s1350_s11, %s1335_s12, %s1798_s15, %s1798_s15, %s1799_s16  }
 0x2df PF: > { %s1364_s17 = sand.u32 1, %s1777_s18   ;;  %p2291_p12 = scmp.ge.s32.totalorder %s1789_s21, 2 }
 0x2e0   : > { %s1365_s23 = scalar_lea.sflag [#allocation4], %s1364_s17 }
 0x2e1   : > { %p1542_p13 = pnand %p2291_p12, %p1865_p6 }
 0x2e3   : > { %p1543_p0 = pneg %p1542_p13 }
 0x2e5   : > { %1772 = dma.done.wait (%p1543_p0), %s1365_s23, 4096  }
 0x2e6   : > { %1774 = vsyncadd (%p1543_p0), %s1365_s23, 4294963200  ;;  %p20_p3 = scmp.ge.s32.totalorder %s1897_s27, 4   ;;  %s2292_s18 = smov %s1781_s19 }
 0x2e7   : > { %s2293_s19 = smov %s1785_s20  ;;  %s2294_s20 = smov %s1909_s6 }
 0x2e8   : > { %s2295_s21 = smov %s1897_s27  ;;  %22 = sbr.rel (!%p20_p3) target bundleno = 7 (0x7), region = 98 }
 0x2ed   :  { %1371 = vsyncpa [#allocation3], 1 }
 0x2ee   :  { %1373 = vsyncpa [#allocation3 + $0x1], 1 }
 0x2ef   :  { %1374 = vsyncpa [#allocation6], 1 }
 0x2f0   :  { %1375 = vsyncpa [#allocation9], 1 }
 0x2f1   :  { %1376 = vsyncpa [#allocation4], 1 }
 0x2f2   :  { %1378 = vsyncpa [#allocation4 + $0x1], 1 }

</bundles_post_ra>
